<compile_context>
chip_gen: v7x
topology: tpu7x:2x2x1
jax: 0.10.0
libtpu: 0.0.40
codegen_flags: <defaults>
</compile_context>

<pallas_src>
import functools

import jax
import jax.numpy as jnp
from jax import lax
from jax.experimental import pallas as pl
from jax.experimental.pallas import tpu as pltpu


def _pam_flash_kernel(q_ref, k_ref, xv_ref, xr_ref, wv_ref, bv_ref, gamma_ref,
                      out_ref, m_sc, l_sc, acc_sc, *, n_valid, n_padded):
    """Grid = (batch, q-tile, kv-tile); kv is the sequential reduction axis.

    q_ref : (1, C8, tq) projected query tile   k_ref : (1, C8, tk) projected key tile
    xv_ref: (1, C,  tk) raw x (value source)   xr_ref: (1, C,  tq) raw x (residual)
    wv_ref: (C, C)  bv_ref: (C, 1) f32  gamma_ref: (1, 1) f32 in SMEM
    scratch: m_sc/l_sc (1, tq) f32 online-softmax stats, acc_sc (C, tq) f32.
    """
    ki = pl.program_id(2)

    # ---- once per (batch, q-tile): reset online-softmax state ---------------
    @pl.when(ki == 0)
    def _init():
        m_sc[...] = jnp.full_like(m_sc, -jnp.inf)
        l_sc[...] = jnp.zeros_like(l_sc)
        acc_sc[...] = jnp.zeros_like(acc_sc)

    q = q_ref[0]                                                     # (C8, tq)
    k = k_ref[0]                                                     # (C8, tk)
    tk = k.shape[1]

    # s[m, n] = <k[:, m], q[:, n]> == energy[n, m]; contraction over dim 0 of
    # both operands (no explicit transpose of k).
    s = lax.dot_general(k, q, (((0,), (0,)), ((), ())),
                        preferred_element_type=jnp.float32)          # (tk, tq)

    if n_padded > n_valid:                                           # static branch
        key_pos = ki * tk + lax.broadcasted_iota(jnp.int32, s.shape, 0)
        s = jnp.where(key_pos < n_valid, s, -jnp.inf)

    # Online softmax over the key axis (sublanes); stats are (1, tq) and
    # broadcast for free over the (C, tq) accumulator.
    m_prev = m_sc[...]
    m_new = jnp.maximum(m_prev, jnp.max(s, axis=0, keepdims=True))   # (1, tq)
    alpha = jnp.exp(m_prev - m_new)                                  # (1, tq)
    p = jnp.exp(s - m_new)                                           # (tk, tq), unnormalized
    l_sc[...] = alpha * l_sc[...] + jnp.sum(p, axis=0, keepdims=True)
    acc_sc[...] = alpha * acc_sc[...] + jnp.dot(
        xv_ref[0], p.astype(xv_ref.dtype), preferred_element_type=jnp.float32)
    m_sc[...] = m_new

    # ---- once per (batch, q-tile): normalize, apply Wv + bv, add residual ---
    @pl.when(ki == pl.num_programs(2) - 1)
    def _finalize():
        inv_l = pl.reciprocal(l_sc[...], approx=True)                # EUP, (1, tq)
        ctx = acc_sc[...] * inv_l                                    # (C, tq) = x @ attn^T
        attn_out = jnp.dot(wv_ref[...], ctx.astype(wv_ref.dtype),
                           preferred_element_type=jnp.float32) + bv_ref[...]
        out = gamma_ref[0, 0] * attn_out + xr_ref[0].astype(jnp.float32)
        out_ref[0] = out.astype(out_ref.dtype)                       # lane-dense (C, tq)


def _choose_tiling(n: int, target: int):
    """Return (tile, n_padded) with tile | n_padded.

    If n <= target, use one full-axis tile (full-dim blocks are exempt from the
    128-lane rule).  Otherwise use a multiple-of-128 tile: one that divides n
    exactly if possible, else pad n up to a multiple of the tile (padded keys
    are masked in-kernel, padded query columns sliced off after the call).
    """
    if n <= target:
        return n, n
    t_cap = max(128, (target // 128) * 128)
    for t in range(t_cap, 127, -128):
        if n % t == 0:
            return t, n
    n_pad = ((n + t_cap - 1) // t_cap) * t_cap
    return t_cap, n_pad


def pam_forward(x_nchw, wq, bq, wk, bk, wv, bv, gamma, *,
                tile_target=512, matmul_dtype=None):
    """PAM_Module.forward.  x: (B, C, H, W); wq/wk: (C//8, C); wv: (C, C)."""
    B, C, H, W = x_nchw.shape
    N = H * W
    C8 = wq.shape[0]
    out_dtype = x_nchw.dtype
    cdt = jnp.dtype(matmul_dtype) if matmul_dtype is not None else jnp.dtype(out_dtype)

    t, N_pad = _choose_tiling(N, tile_target)
    grid = (B, N_pad // t, N_pad // t)

    # Free reshape NCHW -> (B, C, N): channels on sublanes, spatial on lanes.
    x_cn = x_nchw.reshape(B, C, N)
    if N_pad != N:
        x_cn = jnp.pad(x_cn, ((0, 0), (0, 0), (0, N_pad - N)))

    # Hoisted q/k projections (done once here instead of once per kv step).
    x_c = x_cn.astype(cdt)                          # matmul-dtype copy (value source)
    wq_c = wq.astype(cdt)
    wk_c = wk.astype(cdt)
    wv_c = wv.astype(cdt)
    q = (jnp.einsum('oc,bcn->bon', wq_c, x_c, preferred_element_type=jnp.float32)
         + bq.astype(jnp.float32)[None, :, None]).astype(cdt)        # (B, C8, N_pad)
    k = (jnp.einsum('oc,bcn->bon', wk_c, x_c, preferred_element_type=jnp.float32)
         + bk.astype(jnp.float32)[None, :, None]).astype(cdt)        # (B, C8, N_pad)

    bv2 = bv.reshape(C, 1).astype(jnp.float32)
    gamma2 = jnp.reshape(gamma, (1, 1)).astype(jnp.float32)

    # Per-generation VMEM budget with headroom (v5e/v6e 128 MiB, v7x 64 MiB).
    try:
        vmem_cap = int(pltpu.get_tpu_info().vmem_capacity_bytes)
    except Exception:
        vmem_cap = 64 * 1024 * 1024
    vmem_limit = vmem_cap * 3 // 4

    isz = jnp.dtype(cdt).itemsize
    osz = jnp.dtype(out_dtype).itemsize
    kv_steps = N_pad // t
    cost = pl.CostEstimate(
        flops=int(2 * B * N_pad * N_pad * (C + C8) + 2 * B * N_pad * C * C),
        transcendentals=int(B * N_pad * N_pad),
        bytes_accessed=int(B * N_pad * kv_steps * (C + C8) * isz     # k + x(value) re-stream
                           + B * N_pad * (C8 * isz + 2 * C * osz)    # q + residual + output
                           + C * C * isz + C * 4),                   # weights
    )

    kernel = functools.partial(_pam_flash_kernel, n_valid=N, n_padded=N_pad)

    def _call(single_buffer_weights: bool):
        const_kw = dict(pipeline_mode=pl.Buffered(1)) if single_buffer_weights else {}
        grid_spec = pltpu.PrefetchScalarGridSpec(
            num_scalar_prefetch=0,
            grid=grid,
            in_specs=[
                pl.BlockSpec((1, C8, t), lambda b, qi, ki: (b, 0, qi)),      # q tile
                pl.BlockSpec((1, C8, t), lambda b, qi, ki: (b, 0, ki)),      # k tile
                pl.BlockSpec((1, C, t), lambda b, qi, ki: (b, 0, ki)),       # x (values)
                pl.BlockSpec((1, C, t), lambda b, qi, ki: (b, 0, qi)),       # x (residual)
                pl.BlockSpec((C, C), lambda b, qi, ki: (0, 0), **const_kw),  # Wv
                pl.BlockSpec((C, 1), lambda b, qi, ki: (0, 0), **const_kw),  # bv
                pl.BlockSpec(memory_space=pltpu.MemorySpace.SMEM),           # gamma
            ],
            out_specs=pl.BlockSpec((1, C, t), lambda b, qi, ki: (b, 0, qi)),
            scratch_shapes=[
                pltpu.VMEM((1, t), jnp.float32),    # running max
                pltpu.VMEM((1, t), jnp.float32),    # running denominator
                pltpu.VMEM((C, t), jnp.float32),    # accumulator (x @ attn^T)
            ],
        )
        return pl.pallas_call(
            kernel,
            out_shape=jax.ShapeDtypeStruct((B, C, N_pad), out_dtype),
            grid_spec=grid_spec,
            compiler_params=pltpu.CompilerParams(
                dimension_semantics=("parallel", "parallel", "arbitrary"),
                vmem_limit_bytes=vmem_limit,
            ),
            cost_estimate=cost,
        )(q, k, x_c, x_cn, wv_c, bv2, gamma2)

    try:
        out_cn = _call(True)
    except Exception:
        # Fallback if this jax build rejects single-buffered constant blocks.
        out_cn = _call(False)

    if N_pad != N:
        out_cn = out_cn[:, :, :N]
    return out_cn.reshape(B, C, H, W)


def pam_reference(x, wq, bq, wk, bk, wv, bv, gamma):
    """Plain-JAX reference mirroring the PyTorch forward exactly."""
    B, C, H, W = x.shape
    N = H * W
    xf = x.reshape(B, C, N)
    q = jnp.einsum('oc,bcn->bon', wq, xf) + bq[None, :, None]   # (B, C8, N)
    k = jnp.einsum('oc,bcn->bon', wk, xf) + bk[None, :, None]   # (B, C8, N)
    v = jnp.einsum('oc,bcn->bon', wv, xf) + bv[None, :, None]   # (B, C,  N)
    energy = jnp.einsum('bcn,bcm->bnm', q, k)                   # (B, N, N)
    attn = jax.nn.softmax(energy, axis=-1)
    out = jnp.einsum('bcm,bnm->bcn', v, attn)                   # (B, C, N)
    out = out.reshape(B, C, H, W)
    return gamma * out + x


if __name__ == "__main__":
    key = jax.random.PRNGKey(0)

    def make_params(k, C):
        C8 = max(C // 8, 1)
        ks = jax.random.split(k, 6)
        wq = jax.random.normal(ks[0], (C8, C), jnp.float32) * 0.1
        bq = jax.random.normal(ks[1], (C8,), jnp.float32) * 0.1
        wk = jax.random.normal(ks[2], (C8, C), jnp.float32) * 0.1
        bk = jax.random.normal(ks[3], (C8,), jnp.float32) * 0.1
        wv = jax.random.normal(ks[4], (C, C), jnp.float32) * 0.1
        bv = jax.random.normal(ks[5], (C,), jnp.float32) * 0.1
        return wq, bq, wk, bk, wv, bv

    # Module __init__ sets gamma = 0 (output == x); use a nonzero value so the
    # attention path is actually exercised and checked.
    gamma = jnp.array([0.25], jnp.float32)

    # --- Test 1: toy module shapes (B, C, H, W) = (2, 16, 8, 8), f32 ---------
    k0, k1 = jax.random.split(key)
    B, C, H, W = 2, 16, 8, 8
    x = jax.random.normal(k0, (B, C, H, W), jnp.float32)
    params = make_params(k1, C)
    out = jax.block_until_ready(pam_forward(x, *params, gamma))
    ref = pam_reference(x, *params, gamma[0])
    assert out.shape == (B, C, H, W)
    err = float(jnp.max(jnp.abs(out - ref)))
    assert jnp.allclose(out, ref, atol=3e-3, rtol=3e-3), f"f32 mismatch: {err}"

    # --- Test 2: non-divisible H*W (pad-and-mask) + multi-step kv loop, C8=8 -
    k2, k3 = jax.random.split(k1)
    B2, C2, H2, W2 = 1, 64, 16, 10                 # N = 160 -> padded to 256, tile 128
    x2 = jax.random.normal(k2, (B2, C2, H2, W2), jnp.float32)
    params2 = make_params(k3, C2)
    out2 = jax.block_until_ready(pam_forward(x2, *params2, gamma, tile_target=128))
    ref2 = pam_reference(x2, *params2, gamma[0])
    err2 = float(jnp.max(jnp.abs(out2 - ref2)))
    assert jnp.allclose(out2, ref2, atol=3e-3, rtol=3e-3), f"padded mismatch: {err2}"

    # --- Test 3: bf16 MXU-operand path (stats / accumulator / residual in f32)
    out3 = jax.block_until_ready(
        pam_forward(x, *params, gamma, matmul_dtype=jnp.bfloat16))
    err3 = float(jnp.max(jnp.abs(out3 - ref)))
    assert jnp.allclose(out3, ref, atol=5e-2, rtol=5e-2), f"bf16 mismatch: {err3}"

    print("KERNEL_OK")
</pallas_src>

<mosaic_0001>
module attributes {stable_mosaic.version = 11 : i64} {
  func.func @_pam_flash_kernel(%arg0: i32, %arg1: i32, %arg2: i32, %arg3: memref<1x2x64xf32, #tpu.memory_space<vmem>>, %arg4: memref<1x2x64xf32, #tpu.memory_space<vmem>>, %arg5: memref<1x16x64xf32, #tpu.memory_space<vmem>>, %arg6: memref<1x16x64xf32, #tpu.memory_space<vmem>>, %arg7: memref<16x16xf32, #tpu.memory_space<vmem>>, %arg8: memref<16x1xf32, #tpu.memory_space<vmem>>, %arg9: memref<1x1xf32, #tpu.memory_space<smem>>, %arg10: memref<1x16x64xf32, #tpu.memory_space<vmem>>, %arg11: memref<1x64xf32, #tpu.memory_space<vmem>>, %arg12: memref<1x64xf32, #tpu.memory_space<vmem>>, %arg13: memref<16x64xf32, #tpu.memory_space<vmem>>) attributes {dimension_semantics = [#tpu.dimension_semantics<parallel>, #tpu.dimension_semantics<parallel>, #tpu.dimension_semantics<arbitrary>], iteration_bounds = array<i64: 2, 1, 1>, scalar_prefetch = 0 : i64, scratch_operands = 3 : i64, tpu.core_type = #tpu.core_type<tc>, window_params = [{transform_indices = @transform_0, window_bounds = array<i64: 1, 2, 64>}, {transform_indices = @transform_1, window_bounds = array<i64: 1, 2, 64>}, {transform_indices = @transform_2, window_bounds = array<i64: 1, 16, 64>}, {transform_indices = @transform_3, window_bounds = array<i64: 1, 16, 64>}, {pipeline_mode = #tpu.pipeline_mode<synchronous>, transform_indices = @transform_4, window_bounds = array<i64: 16, 16>}, {pipeline_mode = #tpu.pipeline_mode<synchronous>, transform_indices = @transform_5, window_bounds = array<i64: 16, 1>}, {transform_indices = @transform_6, window_bounds = array<i64: 1, 1>}, {transform_indices = @transform_7, window_bounds = array<i64: 1, 16, 64>}]} {
    %c0_i32 = arith.constant 0 : i32
    %0 = arith.cmpi eq, %arg2, %c0_i32 : i32
    %1 = arith.extui %0 : i1 to i32
    %c0_i32_0 = arith.constant 0 : i32
    %2 = arith.cmpi ne, %1, %c0_i32_0 : i32
    scf.if %2 {
      %cst_26 = arith.constant 0xFF800000 : f32
      %35 = vector.broadcast %cst_26 : f32 to vector<1x64xf32>
      %c0_27 = arith.constant 0 : index
      %c0_28 = arith.constant 0 : index
      %36 = vector.load %arg11[%c0_27, %c0_28] : memref<1x64xf32, #tpu.memory_space<vmem>>, vector<1x64xf32>
      tpu.vector_store %arg11[%c0_27, %c0_28], %35 {strides = array<i32>} : memref<1x64xf32, #tpu.memory_space<vmem>>, vector<1x64xf32>,
      %cst_29 = arith.constant 0.000000e+00 : f32
      %37 = vector.broadcast %cst_29 : f32 to vector<1x64xf32>
      %c0_30 = arith.constant 0 : index
      %c0_31 = arith.constant 0 : index
      %38 = vector.load %arg12[%c0_30, %c0_31] : memref<1x64xf32, #tpu.memory_space<vmem>>, vector<1x64xf32>
      tpu.vector_store %arg12[%c0_30, %c0_31], %37 {strides = array<i32>} : memref<1x64xf32, #tpu.memory_space<vmem>>, vector<1x64xf32>,
      %cst_32 = arith.constant 0.000000e+00 : f32
      %39 = vector.broadcast %cst_32 : f32 to vector<16x64xf32>
      %c0_33 = arith.constant 0 : index
      %c0_34 = arith.constant 0 : index
      %40 = vector.load %arg13[%c0_33, %c0_34] : memref<16x64xf32, #tpu.memory_space<vmem>>, vector<16x64xf32>
      tpu.vector_store %arg13[%c0_33, %c0_34], %39 {strides = array<i32>} : memref<16x64xf32, #tpu.memory_space<vmem>>, vector<16x64xf32>,
    } else {
    }
    %c0 = arith.constant 0 : index
    %c0_1 = arith.constant 0 : index
    %c0_2 = arith.constant 0 : index
    %3 = vector.load %arg3[%c0, %c0_1, %c0_2] : memref<1x2x64xf32, #tpu.memory_space<vmem>>, vector<1x2x64xf32>
    %4 = vector.shape_cast %3 : vector<1x2x64xf32> to vector<2x64xf32>
    %c0_3 = arith.constant 0 : index
    %c0_4 = arith.constant 0 : index
    %c0_5 = arith.constant 0 : index
    %5 = vector.load %arg4[%c0_3, %c0_4, %c0_5] : memref<1x2x64xf32, #tpu.memory_space<vmem>>, vector<1x2x64xf32>
    %6 = vector.shape_cast %5 : vector<1x2x64xf32> to vector<2x64xf32>
    %cst = arith.constant dense<0.000000e+00> : vector<64x64xf32>
    %7 = tpu.matmul %6, %4, %cst {dimension_numbers = #tpu.dot_dimension_numbers<[0], [0], [1], [1], [0, 1, 1, 1], [], []>} : vector<2x64xf32>, vector<2x64xf32>, vector<64x64xf32> -> vector<64x64xf32>
    %c0_6 = arith.constant 0 : index
    %c0_7 = arith.constant 0 : index
    %8 = vector.load %arg11[%c0_6, %c0_7] : memref<1x64xf32, #tpu.memory_space<vmem>>, vector<1x64xf32>
    %cst_8 = arith.constant dense<0xFF800000> : vector<64xf32>
    %9 = vector.multi_reduction <maximumf>, %7, %cst_8 [0] : vector<64x64xf32> to vector<64xf32>
    %10 = vector.shape_cast %9 : vector<64xf32> to vector<1x64xf32>
    %11 = arith.maximumf %8, %10 : vector<1x64xf32>
    %12 = arith.subf %8, %11 : vector<1x64xf32>
    %13 = math.exp %12 : vector<1x64xf32>
    %14 = vector.broadcast %11 : vector<1x64xf32> to vector<64x64xf32>
    %15 = arith.subf %7, %14 : vector<64x64xf32>
    %16 = math.exp %15 : vector<64x64xf32>
    %c0_9 = arith.constant 0 : index
    %c0_10 = arith.constant 0 : index
    %17 = vector.load %arg12[%c0_9, %c0_10] : memref<1x64xf32, #tpu.memory_space<vmem>>, vector<1x64xf32>
    %18 = arith.mulf %13, %17 : vector<1x64xf32>
    %cst_11 = arith.constant dense<0.000000e+00> : vector<64xf32>
    %19 = vector.multi_reduction <add>, %16, %cst_11 [0] : vector<64x64xf32> to vector<64xf32>
    %20 = vector.shape_cast %19 : vector<64xf32> to vector<1x64xf32>
    %21 = arith.addf %18, %20 : vector<1x64xf32>
    %c0_12 = arith.constant 0 : index
    %c0_13 = arith.constant 0 : index
    %22 = vector.load %arg12[%c0_12, %c0_13] : memref<1x64xf32, #tpu.memory_space<vmem>>, vector<1x64xf32>
    tpu.vector_store %arg12[%c0_12, %c0_13], %21 {strides = array<i32>} : memref<1x64xf32, #tpu.memory_space<vmem>>, vector<1x64xf32>,
    %c0_14 = arith.constant 0 : index
    %c0_15 = arith.constant 0 : index
    %23 = vector.load %arg13[%c0_14, %c0_15] : memref<16x64xf32, #tpu.memory_space<vmem>>, vector<16x64xf32>
    %24 = vector.broadcast %13 : vector<1x64xf32> to vector<16x64xf32>
    %25 = arith.mulf %24, %23 : vector<16x64xf32>
    %c0_16 = arith.constant 0 : index
    %c0_17 = arith.constant 0 : index
    %c0_18 = arith.constant 0 : index
    %26 = vector.load %arg5[%c0_16, %c0_17, %c0_18] : memref<1x16x64xf32, #tpu.memory_space<vmem>>, vector<1x16x64xf32>
    %27 = vector.shape_cast %26 : vector<1x16x64xf32> to vector<16x64xf32>
    %cst_19 = arith.constant dense<0.000000e+00> : vector<16x64xf32>
    %28 = tpu.matmul %27, %16, %cst_19 {dimension_numbers = #tpu.dot_dimension_numbers<[1], [0], [0], [1], [0, 0, 1, 1], [], []>} : vector<16x64xf32>, vector<64x64xf32>, vector<16x64xf32> -> vector<16x64xf32>
    %29 = arith.addf %25, %28 : vector<16x64xf32>
    %c0_20 = arith.constant 0 : index
    %c0_21 = arith.constant 0 : index
    %30 = vector.load %arg13[%c0_20, %c0_21] : memref<16x64xf32, #tpu.memory_space<vmem>>, vector<16x64xf32>
    tpu.vector_store %arg13[%c0_20, %c0_21], %29 {strides = array<i32>} : memref<16x64xf32, #tpu.memory_space<vmem>>, vector<16x64xf32>,
    %c0_22 = arith.constant 0 : index
    %c0_23 = arith.constant 0 : index
    %31 = vector.load %arg11[%c0_22, %c0_23] : memref<1x64xf32, #tpu.memory_space<vmem>>, vector<1x64xf32>
    tpu.vector_store %arg11[%c0_22, %c0_23], %11 {strides = array<i32>} : memref<1x64xf32, #tpu.memory_space<vmem>>, vector<1x64xf32>,
    %c0_i32_24 = arith.constant 0 : i32
    %32 = arith.cmpi eq, %arg2, %c0_i32_24 : i32
    %33 = arith.extui %32 : i1 to i32
    %c0_i32_25 = arith.constant 0 : i32
    %34 = arith.cmpi ne, %33, %c0_i32_25 : i32
    scf.if %34 {
      %c0_26 = arith.constant 0 : index
      %c0_27 = arith.constant 0 : index
      %35 = vector.load %arg12[%c0_26, %c0_27] : memref<1x64xf32, #tpu.memory_space<vmem>>, vector<1x64xf32>
      %36 = tpu.reciprocal %35 {approx = true} : vector<1x64xf32> -> vector<1x64xf32>
      %c0_28 = arith.constant 0 : index
      %c0_29 = arith.constant 0 : index
      %37 = vector.load %arg13[%c0_28, %c0_29] : memref<16x64xf32, #tpu.memory_space<vmem>>, vector<16x64xf32>
      %38 = vector.broadcast %36 : vector<1x64xf32> to vector<16x64xf32>
      %39 = arith.mulf %37, %38 : vector<16x64xf32>
      %c0_30 = arith.constant 0 : index
      %c0_31 = arith.constant 0 : index
      %40 = vector.load %arg7[%c0_30, %c0_31] : memref<16x16xf32, #tpu.memory_space<vmem>>, vector<16x16xf32>
      %cst_32 = arith.constant dense<0.000000e+00> : vector<16x64xf32>
      %41 = tpu.matmul %40, %39, %cst_32 {dimension_numbers = #tpu.dot_dimension_numbers<[1], [0], [0], [1], [0, 0, 1, 1], [], []>} : vector<16x16xf32>, vector<16x64xf32>, vector<16x64xf32> -> vector<16x64xf32>
      %c0_33 = arith.constant 0 : index
      %c0_34 = arith.constant 0 : index
      %42 = vector.load %arg8[%c0_33, %c0_34] : memref<16x1xf32, #tpu.memory_space<vmem>>, vector<16x1xf32>
      %43 = vector.broadcast %42 : vector<16x1xf32> to vector<16x64xf32>
      %44 = arith.addf %41, %43 : vector<16x64xf32>
      %c0_35 = arith.constant 0 : index
      %c0_36 = arith.constant 0 : index
      %45 = memref.load %arg9[%c0_35, %c0_36] : memref<1x1xf32, #tpu.memory_space<smem>>
      %46 = vector.broadcast %45 : f32 to vector<16x64xf32>
      %47 = arith.mulf %46, %44 : vector<16x64xf32>
      %c0_37 = arith.constant 0 : index
      %c0_38 = arith.constant 0 : index
      %c0_39 = arith.constant 0 : index
      %48 = vector.load %arg6[%c0_37, %c0_38, %c0_39] : memref<1x16x64xf32, #tpu.memory_space<vmem>>, vector<1x16x64xf32>
      %49 = vector.shape_cast %48 : vector<1x16x64xf32> to vector<16x64xf32>
      %50 = arith.addf %47, %49 : vector<16x64xf32>
      %c0_40 = arith.constant 0 : index
      %c0_41 = arith.constant 0 : index
      %c0_42 = arith.constant 0 : index
      %51 = vector.load %arg10[%c0_40, %c0_41, %c0_42] : memref<1x16x64xf32, #tpu.memory_space<vmem>>, vector<1x16x64xf32>
      %52 = vector.shape_cast %51 : vector<1x16x64xf32> to vector<16x64xf32>
      %53 = vector.shape_cast %50 : vector<16x64xf32> to vector<1x16x64xf32>
      tpu.vector_store %arg10[%c0_40, %c0_41, %c0_42], %53 {strides = array<i32>} : memref<1x16x64xf32, #tpu.memory_space<vmem>>, vector<1x16x64xf32>,
    } else {
    }
    return
  }
  func.func @transform_0(%arg0: i32, %arg1: i32, %arg2: i32) -> (i32, i32, i32) {
    %c0_i32 = arith.constant 0 : i32
    %c0_i32_0 = arith.constant 0 : i32
    return %arg0, %c0_i32, %arg1 : i32, i32, i32
  }
  func.func @transform_1(%arg0: i32, %arg1: i32, %arg2: i32) -> (i32, i32, i32) {
    %c0_i32 = arith.constant 0 : i32
    %c0_i32_0 = arith.constant 0 : i32
    return %arg0, %c0_i32, %arg2 : i32, i32, i32
  }
  func.func @transform_2(%arg0: i32, %arg1: i32, %arg2: i32) -> (i32, i32, i32) {
    %c0_i32 = arith.constant 0 : i32
    %c0_i32_0 = arith.constant 0 : i32
    return %arg0, %c0_i32, %arg2 : i32, i32, i32
  }
  func.func @transform_3(%arg0: i32, %arg1: i32, %arg2: i32) -> (i32, i32, i32) {
    %c0_i32 = arith.constant 0 : i32
    %c0_i32_0 = arith.constant 0 : i32
    return %arg0, %c0_i32, %arg1 : i32, i32, i32
  }
  func.func @transform_4(%arg0: i32, %arg1: i32, %arg2: i32) -> (i32, i32) {
    %c0_i32 = arith.constant 0 : i32
    %c0_i32_0 = arith.constant 0 : i32
    %c0_i32_1 = arith.constant 0 : i32
    return %c0_i32, %c0_i32_0 : i32, i32
  }
  func.func @transform_5(%arg0: i32, %arg1: i32, %arg2: i32) -> (i32, i32) {
    %c0_i32 = arith.constant 0 : i32
    %c0_i32_0 = arith.constant 0 : i32
    %c0_i32_1 = arith.constant 0 : i32
    return %c0_i32, %c0_i32_0 : i32, i32
  }
  func.func @transform_6(%arg0: i32, %arg1: i32, %arg2: i32) -> (i32, i32) {
    %c0_i32 = arith.constant 0 : i32
    %c0_i32_0 = arith.constant 0 : i32
    %c0_i32_1 = arith.constant 0 : i32
    return %c0_i32, %c0_i32_0 : i32, i32
  }
  func.func @transform_7(%arg0: i32, %arg1: i32, %arg2: i32) -> (i32, i32, i32) {
    %c0_i32 = arith.constant 0 : i32
    %c0_i32_0 = arith.constant 0 : i32
    return %arg0, %c0_i32, %arg1 : i32, i32, i32
  }
}

module attributes {stable_mosaic.version = 11 : i64} {
  func.func @_pam_flash_kernel(%arg0: i32, %arg1: i32, %arg2: i32, %arg3: memref<1x2x64xf32, #tpu.memory_space<vmem>>, %arg4: memref<1x2x64xf32, #tpu.memory_space<vmem>>, %arg5: memref<1x16x64xf32, #tpu.memory_space<vmem>>, %arg6: memref<1x16x64xf32, #tpu.memory_space<vmem>>, %arg7: memref<16x16xf32, #tpu.memory_space<vmem>>, %arg8: memref<16x1xf32, #tpu.memory_space<vmem>>, %arg9: memref<1x1xf32, #tpu.memory_space<smem>>, %arg10: memref<1x16x64xf32, #tpu.memory_space<vmem>>, %arg11: memref<1x64xf32, #tpu.memory_space<vmem>>, %arg12: memref<1x64xf32, #tpu.memory_space<vmem>>, %arg13: memref<16x64xf32, #tpu.memory_space<vmem>>) attributes {dimension_semantics = [#tpu.dimension_semantics<parallel>, #tpu.dimension_semantics<parallel>, #tpu.dimension_semantics<arbitrary>], iteration_bounds = array<i64: 2, 1, 1>, scalar_prefetch = 0 : i64, scratch_operands = 3 : i64, tpu.core_type = #tpu.core_type<tc>, window_params = [{transform_indices = @transform_0, window_bounds = array<i64: 1, 2, 64>}, {transform_indices = @transform_1, window_bounds = array<i64: 1, 2, 64>}, {transform_indices = @transform_2, window_bounds = array<i64: 1, 16, 64>}, {transform_indices = @transform_3, window_bounds = array<i64: 1, 16, 64>}, {pipeline_mode = #tpu.pipeline_mode<synchronous>, transform_indices = @transform_4, window_bounds = array<i64: 16, 16>}, {pipeline_mode = #tpu.pipeline_mode<synchronous>, transform_indices = @transform_5, window_bounds = array<i64: 16, 1>}, {transform_indices = @transform_6, window_bounds = array<i64: 1, 1>}, {transform_indices = @transform_7, window_bounds = array<i64: 1, 16, 64>}]} {
    %c0_i32 = arith.constant 0 : i32
    %0 = arith.cmpi eq, %arg2, %c0_i32 : i32
    %1 = arith.extui %0 : i1 to i32
    %c0_i32_0 = arith.constant 0 : i32
    %2 = arith.cmpi ne, %1, %c0_i32_0 : i32
    scf.if %2 {
      %cst_26 = arith.constant 0xFF800000 : f32
      %35 = vector.broadcast %cst_26 : f32 to vector<1x64xf32>
      %c0_27 = arith.constant 0 : index
      %c0_28 = arith.constant 0 : index
      %36 = vector.load %arg11[%c0_27, %c0_28] : memref<1x64xf32, #tpu.memory_space<vmem>>, vector<1x64xf32>
      tpu.vector_store %arg11[%c0_27, %c0_28], %35 {strides = array<i32>} : memref<1x64xf32, #tpu.memory_space<vmem>>, vector<1x64xf32>,
      %cst_29 = arith.constant 0.000000e+00 : f32
      %37 = vector.broadcast %cst_29 : f32 to vector<1x64xf32>
      %c0_30 = arith.constant 0 : index
      %c0_31 = arith.constant 0 : index
      %38 = vector.load %arg12[%c0_30, %c0_31] : memref<1x64xf32, #tpu.memory_space<vmem>>, vector<1x64xf32>
      tpu.vector_store %arg12[%c0_30, %c0_31], %37 {strides = array<i32>} : memref<1x64xf32, #tpu.memory_space<vmem>>, vector<1x64xf32>,
      %cst_32 = arith.constant 0.000000e+00 : f32
      %39 = vector.broadcast %cst_32 : f32 to vector<16x64xf32>
      %c0_33 = arith.constant 0 : index
      %c0_34 = arith.constant 0 : index
      %40 = vector.load %arg13[%c0_33, %c0_34] : memref<16x64xf32, #tpu.memory_space<vmem>>, vector<16x64xf32>
      tpu.vector_store %arg13[%c0_33, %c0_34], %39 {strides = array<i32>} : memref<16x64xf32, #tpu.memory_space<vmem>>, vector<16x64xf32>,
    } else {
    }
    %c0 = arith.constant 0 : index
    %c0_1 = arith.constant 0 : index
    %c0_2 = arith.constant 0 : index
    %3 = vector.load %arg3[%c0, %c0_1, %c0_2] : memref<1x2x64xf32, #tpu.memory_space<vmem>>, vector<1x2x64xf32>
    %4 = vector.shape_cast %3 : vector<1x2x64xf32> to vector<2x64xf32>
    %c0_3 = arith.constant 0 : index
    %c0_4 = arith.constant 0 : index
    %c0_5 = arith.constant 0 : index
    %5 = vector.load %arg4[%c0_3, %c0_4, %c0_5] : memref<1x2x64xf32, #tpu.memory_space<vmem>>, vector<1x2x64xf32>
    %6 = vector.shape_cast %5 : vector<1x2x64xf32> to vector<2x64xf32>
    %cst = arith.constant dense<0.000000e+00> : vector<64x64xf32>
    %7 = tpu.matmul %6, %4, %cst {dimension_numbers = #tpu.dot_dimension_numbers<[0], [0], [1], [1], [0, 1, 1, 1], [], []>} : vector<2x64xf32>, vector<2x64xf32>, vector<64x64xf32> -> vector<64x64xf32>
    %c0_6 = arith.constant 0 : index
    %c0_7 = arith.constant 0 : index
    %8 = vector.load %arg11[%c0_6, %c0_7] : memref<1x64xf32, #tpu.memory_space<vmem>>, vector<1x64xf32>
    %cst_8 = arith.constant dense<0xFF800000> : vector<64xf32>
    %9 = vector.multi_reduction <maximumf>, %7, %cst_8 [0] : vector<64x64xf32> to vector<64xf32>
    %10 = vector.shape_cast %9 : vector<64xf32> to vector<1x64xf32>
    %11 = arith.maximumf %8, %10 : vector<1x64xf32>
    %12 = arith.subf %8, %11 : vector<1x64xf32>
    %13 = math.exp %12 : vector<1x64xf32>
    %14 = vector.broadcast %11 : vector<1x64xf32> to vector<64x64xf32>
    %15 = arith.subf %7, %14 : vector<64x64xf32>
    %16 = math.exp %15 : vector<64x64xf32>
    %c0_9 = arith.constant 0 : index
    %c0_10 = arith.constant 0 : index
    %17 = vector.load %arg12[%c0_9, %c0_10] : memref<1x64xf32, #tpu.memory_space<vmem>>, vector<1x64xf32>
    %18 = arith.mulf %13, %17 : vector<1x64xf32>
    %cst_11 = arith.constant dense<0.000000e+00> : vector<64xf32>
    %19 = vector.multi_reduction <add>, %16, %cst_11 [0] : vector<64x64xf32> to vector<64xf32>
    %20 = vector.shape_cast %19 : vector<64xf32> to vector<1x64xf32>
    %21 = arith.addf %18, %20 : vector<1x64xf32>
    %c0_12 = arith.constant 0 : index
    %c0_13 = arith.constant 0 : index
    %22 = vector.load %arg12[%c0_12, %c0_13] : memref<1x64xf32, #tpu.memory_space<vmem>>, vector<1x64xf32>
    tpu.vector_store %arg12[%c0_12, %c0_13], %21 {strides = array<i32>} : memref<1x64xf32, #tpu.memory_space<vmem>>, vector<1x64xf32>,
    %c0_14 = arith.constant 0 : index
    %c0_15 = arith.constant 0 : index
    %23 = vector.load %arg13[%c0_14, %c0_15] : memref<16x64xf32, #tpu.memory_space<vmem>>, vector<16x64xf32>
    %24 = vector.broadcast %13 : vector<1x64xf32> to vector<16x64xf32>
    %25 = arith.mulf %24, %23 : vector<16x64xf32>
    %c0_16 = arith.constant 0 : index
    %c0_17 = arith.constant 0 : index
    %c0_18 = arith.constant 0 : index
    %26 = vector.load %arg5[%c0_16, %c0_17, %c0_18] : memref<1x16x64xf32, #tpu.memory_space<vmem>>, vector<1x16x64xf32>
    %27 = vector.shape_cast %26 : vector<1x16x64xf32> to vector<16x64xf32>
    %cst_19 = arith.constant dense<0.000000e+00> : vector<16x64xf32>
    %28 = tpu.matmul %27, %16, %cst_19 {dimension_numbers = #tpu.dot_dimension_numbers<[1], [0], [0], [1], [0, 0, 1, 1], [], []>} : vector<16x64xf32>, vector<64x64xf32>, vector<16x64xf32> -> vector<16x64xf32>
    %29 = arith.addf %25, %28 : vector<16x64xf32>
    %c0_20 = arith.constant 0 : index
    %c0_21 = arith.constant 0 : index
    %30 = vector.load %arg13[%c0_20, %c0_21] : memref<16x64xf32, #tpu.memory_space<vmem>>, vector<16x64xf32>
    tpu.vector_store %arg13[%c0_20, %c0_21], %29 {strides = array<i32>} : memref<16x64xf32, #tpu.memory_space<vmem>>, vector<16x64xf32>,
    %c0_22 = arith.constant 0 : index
    %c0_23 = arith.constant 0 : index
    %31 = vector.load %arg11[%c0_22, %c0_23] : memref<1x64xf32, #tpu.memory_space<vmem>>, vector<1x64xf32>
    tpu.vector_store %arg11[%c0_22, %c0_23], %11 {strides = array<i32>} : memref<1x64xf32, #tpu.memory_space<vmem>>, vector<1x64xf32>,
    %c0_i32_24 = arith.constant 0 : i32
    %32 = arith.cmpi eq, %arg2, %c0_i32_24 : i32
    %33 = arith.extui %32 : i1 to i32
    %c0_i32_25 = arith.constant 0 : i32
    %34 = arith.cmpi ne, %33, %c0_i32_25 : i32
    scf.if %34 {
      %c0_26 = arith.constant 0 : index
      %c0_27 = arith.constant 0 : index
      %35 = vector.load %arg12[%c0_26, %c0_27] : memref<1x64xf32, #tpu.memory_space<vmem>>, vector<1x64xf32>
      %36 = tpu.reciprocal %35 {approx = true} : vector<1x64xf32> -> vector<1x64xf32>
      %c0_28 = arith.constant 0 : index
      %c0_29 = arith.constant 0 : index
      %37 = vector.load %arg13[%c0_28, %c0_29] : memref<16x64xf32, #tpu.memory_space<vmem>>, vector<16x64xf32>
      %38 = vector.broadcast %36 : vector<1x64xf32> to vector<16x64xf32>
      %39 = arith.mulf %37, %38 : vector<16x64xf32>
      %c0_30 = arith.constant 0 : index
      %c0_31 = arith.constant 0 : index
      %40 = vector.load %arg7[%c0_30, %c0_31] : memref<16x16xf32, #tpu.memory_space<vmem>>, vector<16x16xf32>
      %cst_32 = arith.constant dense<0.000000e+00> : vector<16x64xf32>
      %41 = tpu.matmul %40, %39, %cst_32 {dimension_numbers = #tpu.dot_dimension_numbers<[1], [0], [0], [1], [0, 0, 1, 1], [], []>} : vector<16x16xf32>, vector<16x64xf32>, vector<16x64xf32> -> vector<16x64xf32>
      %c0_33 = arith.constant 0 : index
      %c0_34 = arith.constant 0 : index
      %42 = vector.load %arg8[%c0_33, %c0_34] : memref<16x1xf32, #tpu.memory_space<vmem>>, vector<16x1xf32>
      %43 = vector.broadcast %42 : vector<16x1xf32> to vector<16x64xf32>
      %44 = arith.addf %41, %43 : vector<16x64xf32>
      %c0_35 = arith.constant 0 : index
      %c0_36 = arith.constant 0 : index
      %45 = memref.load %arg9[%c0_35, %c0_36] : memref<1x1xf32, #tpu.memory_space<smem>>
      %46 = vector.broadcast %45 : f32 to vector<16x64xf32>
      %47 = arith.mulf %46, %44 : vector<16x64xf32>
      %c0_37 = arith.constant 0 : index
      %c0_38 = arith.constant 0 : index
      %c0_39 = arith.constant 0 : index
      %48 = vector.load %arg6[%c0_37, %c0_38, %c0_39] : memref<1x16x64xf32, #tpu.memory_space<vmem>>, vector<1x16x64xf32>
      %49 = vector.shape_cast %48 : vector<1x16x64xf32> to vector<16x64xf32>
      %50 = arith.addf %47, %49 : vector<16x64xf32>
      %c0_40 = arith.constant 0 : index
      %c0_41 = arith.constant 0 : index
      %c0_42 = arith.constant 0 : index
      %51 = vector.load %arg10[%c0_40, %c0_41, %c0_42] : memref<1x16x64xf32, #tpu.memory_space<vmem>>, vector<1x16x64xf32>
      %52 = vector.shape_cast %51 : vector<1x16x64xf32> to vector<16x64xf32>
      %53 = vector.shape_cast %50 : vector<16x64xf32> to vector<1x16x64xf32>
      tpu.vector_store %arg10[%c0_40, %c0_41, %c0_42], %53 {strides = array<i32>} : memref<1x16x64xf32, #tpu.memory_space<vmem>>, vector<1x16x64xf32>,
    } else {
    }
    return
  }
  func.func @transform_0(%arg0: i32, %arg1: i32, %arg2: i32) -> (i32, i32, i32) {
    %c0_i32 = arith.constant 0 : i32
    %c0_i32_0 = arith.constant 0 : i32
    return %arg0, %c0_i32, %arg1 : i32, i32, i32
  }
  func.func @transform_1(%arg0: i32, %arg1: i32, %arg2: i32) -> (i32, i32, i32) {
    %c0_i32 = arith.constant 0 : i32
    %c0_i32_0 = arith.constant 0 : i32
    return %arg0, %c0_i32, %arg2 : i32, i32, i32
  }
  func.func @transform_2(%arg0: i32, %arg1: i32, %arg2: i32) -> (i32, i32, i32) {
    %c0_i32 = arith.constant 0 : i32
    %c0_i32_0 = arith.constant 0 : i32
    return %arg0, %c0_i32, %arg2 : i32, i32, i32
  }
  func.func @transform_3(%arg0: i32, %arg1: i32, %arg2: i32) -> (i32, i32, i32) {
    %c0_i32 = arith.constant 0 : i32
    %c0_i32_0 = arith.constant 0 : i32
    return %arg0, %c0_i32, %arg1 : i32, i32, i32
  }
  func.func @transform_4(%arg0: i32, %arg1: i32, %arg2: i32) -> (i32, i32) {
    %c0_i32 = arith.constant 0 : i32
    %c0_i32_0 = arith.constant 0 : i32
    %c0_i32_1 = arith.constant 0 : i32
    return %c0_i32, %c0_i32_0 : i32, i32
  }
  func.func @transform_5(%arg0: i32, %arg1: i32, %arg2: i32) -> (i32, i32) {
    %c0_i32 = arith.constant 0 : i32
    %c0_i32_0 = arith.constant 0 : i32
    %c0_i32_1 = arith.constant 0 : i32
    return %c0_i32, %c0_i32_0 : i32, i32
  }
  func.func @transform_6(%arg0: i32, %arg1: i32, %arg2: i32) -> (i32, i32) {
    %c0_i32 = arith.constant 0 : i32
    %c0_i32_0 = arith.constant 0 : i32
    %c0_i32_1 = arith.constant 0 : i32
    return %c0_i32, %c0_i32_0 : i32, i32
  }
  func.func @transform_7(%arg0: i32, %arg1: i32, %arg2: i32) -> (i32, i32, i32) {
    %c0_i32 = arith.constant 0 : i32
    %c0_i32_0 = arith.constant 0 : i32
    return %arg0, %c0_i32, %arg1 : i32, i32, i32
  }
}

</mosaic_0001>

<bundles_post_ra>
// kernel: tpu_custom_call.1
= control target key start
LH: loop header
LB: loop body
LE: loop exit
PB: predicated region body
PF: predicated region fallthrough
CT: control target
= control target key end

     0   :  { %s1974_s0 = inlined_call_operand.hbm [shape: f32[2,2,64], index: 0, kind: input, shape index: {}]   ;;  %s1975_s1 = inlined_call_operand.hbm [shape: f32[2,2,64], index: 1, kind: input, shape index: {}]   ;;  %s1976_s2 = inlined_call_operand.hbm [shape: f32[2,16,64], index: 2, kind: input, shape index: {}]   ;;  %s1977_s3 = inlined_call_operand.vmem [shape: f32[2,16,64], index: 3, kind: input, shape index: {}]   ;;  %s1978_s4 = inlined_call_operand.hbm [shape: f32[16,16], index: 4, kind: input, shape index: {}]   ;;  %s1979_s5 = inlined_call_operand.vmem [shape: f32[16,1], index: 5, kind: input, shape index: {}]   ;;  %s1980_s6 = inlined_call_operand.<no memory space> [shape: f32[1,1], index: 6, kind: input, shape index: {}]   ;;  %s1981_s7 = inlined_call_operand.hbm [shape: f32[2,16,64], index: 7, kind: output, shape index: {}]  }
   0x1   :  { %2001 = sst [smem:[#allocation26_spill]] %s1975_s1 }
   0x2   :  { %2002 = sst [smem:[#allocation27_spill]] %s1981_s7 }
   0x3   :  { %12 = sst [smem:[#allocation5]] %s1980_s6 }
   0x4   :  { %13 = vsyncpa [#allocation7], 0 }
   0x5   :  { %15 = vsyncpa [#allocation7 + $0x1], 0 }
   0x6   :  { %16 = vsyncpa [#allocation10], 0 }
   0x7   :  { %18 = vsyncpa [#allocation10 + $0x1], 0 }
   0x8   :  { %19 = vsyncpa [#allocation13], 0 }
   0x9   :  { %20 = vsyncpa [#allocation8], 0 }
   0xa   :  { %22 = vsyncpa [#allocation8 + $0x1], 0  ;;  %s1602_s26 = smov 0   ;;  %s1604_s27 = smov 0  }
   0xb   :  { %s1606_s28 = smov 0   ;;  %s1608_s29 = smov 0  }
   0xc   :  { %s1610_s30 = smov 0   ;;  %s1612_s8 = smov 0  }
   0xd LB: > { %2003 = sst [smem:[#allocation19_spill]] %s1525_s26  ;;  %s47_s6 = sadd.s32 1, %s1541_s30  ;;  %s1545_s8 = sphi %s1612_s8, %s28_s8   ;;  %s1541_s30 = sphi %s1610_s30, %s2041_s30   ;;  %s1537_s29 = sphi %s1608_s29, %s2040_s29   ;;  %s1533_s28 = sphi %s1606_s28, %s2036_s28   ;;  %s1529_s27 = sphi %s1604_s27, %s2039_s27   ;;  %s1525_s26 = sphi %s1602_s26, %s2038_s26  }
   0xe   : > { %2004 = sst [smem:[#allocation20_spill]] %s1533_s28  ;;  %s56_s9 = sadd.s32 1, %s1533_s28 }
   0xf   : > { %2005 = sst [smem:[#allocation21_spill]] %s1545_s8  ;;  %p49_p0 = scmp.ge.s32.totalorder %s47_s6, 2 }
  0x10   : > { %p1982_p1 = scmp.ne.s32.totalorder %s1533_s28, %s1529_s27  ;;  %p64_p2 = scmp.eq.s32.totalorder %s1545_s8, 0 }
  0x11   : > { %s2043_s6 = smov (%p49_p0, %s47_s6), 0  ;;  %p1256_p5 = scmp.lt.s32.totalorder %s1545_s8, 2 }
  0x12   : > { %2006 = sst [smem:[#allocation22_spill]] %s2043_s6  ;;  %p65_p4 = por %p64_p2, %p1982_p1 }
  0x13   : > { %s51_s10 = ssub.s32 %s1541_s30, %s2043_s6  ;;  %s1647_s11 = sand.u32 1, %s1533_s28  }
  0x14   : > { %p54_p6 = scmp.eq.s32.totalorder %s51_s10, 0  ;;  %s1983_s12 = sshll.u32 %s1647_s11, 1 }
  0x15   : > { %s1107_s13 = sshll.u32 %s1541_s30, 5  ;;  %p1651_p7 = pnand %p1256_p5, %p65_p4 }
  0x16   : > { %s1656_s15 = scalar_select %p54_p6, %s1533_s28, %s56_s9  }
  0x17   : > { %s2007_s14 = scalar_select %p1651_p7, 1, 0 }
  0x18   : > { %2008 = sst [smem:[#allocation23_spill]] %s1656_s15  ;;  %s306_s16 = sand.u32 1, %s1545_s8  }
  0x19   : > { %s2009_s1 = sld [smem:[#allocation26_spill]]  ;;  %s310_s20 = scalar_lea.vmem [#allocation9], %s1983_s12 }
  0x1a   : > { %s318_s21 = sshll.u32 %s310_s20, 4  ;;  %s1110_s22 = sshll.u32 %s1647_s11, 4  ;;  %s1668_s21 = int_to_ptr.vmem [resolvable:$true] %s318_s21 }
  0x1b   : > { %s1671_s23 = scalar_lea.sflag [#allocation10], %s306_s16  ;;  %p1677_p9 = pneg %p1651_p7 }
  0x1d   : > { %s2010_s25 = scalar_select %p1677_p9, 1, 0 }
  0x1f   : > { %s1664_s19 = scalar_lea.hbm %s2009_s1, %s1107_s13  ;;  %s1342_s17 = scalar_lea.hbm %s2009_s1, 64 }
  0x20   : > { %s1337_s24 = scalar_lea.hbm %s1664_s19, 32  ;;  %p1343_p12 = scmp.lt.u32.totalorder %s1664_s19, %s2009_s1 }
  0x21   : > { %p1338_p8 = scmp.ne.s32.totalorder %s1664_s19, %s1337_s24  ;;  %p1344_p13 = scmp.lt.u32.totalorder %s1342_s17, %s1337_s24 }
  0x22   : > { %p1346_p2 = scmp.lt.u32.totalorder %s1337_s24, %s1664_s19 }
  0x23   : > { %p1340_p10 = pnand %p1677_p9, %p1338_p8  ;;  %p1345_p0 = por %p1344_p13, %p1343_p12 }
  0x25   : > { %p1341_p11 = pneg %p1340_p10  ;;  %p1347_p4 = por %p1346_p2, %p1345_p0 }
  0x27   : > { %p1348_p5 = pnand %p1347_p4, %p1341_p11 }
  0x29   : > { %1351 = shalt.err (!%p1348_p5)
}
  0x2a   : > { %s1352_s16 = scalar_lea.vmem %s1668_s21, 32  ;;  %s1547_s9 = smov [#allocation9]  }
  0x2b   : > { %p1353_p6 = scmp.ne.s32.totalorder %s1668_s21, %s1352_s16  ;;  %s1357_s10 = sshll.u32 %s1547_s9, 4  ;;  %s1358_s10 = int_to_ptr.vmem [resolvable:$false] %s1357_s10 }
  0x2c   : > { %s1359_s18 = scalar_lea.vmem %s1358_s10, 64  ;;  %p1360_p3 = scmp.lt.s32.totalorder %s1668_s21, %s1358_s10 }
  0x2d   : > { %p1355_p8 = pnand %p1353_p6, %p1677_p9  ;;  %p1361_p1 = scmp.lt.s32.totalorder %s1359_s18, %s1352_s16 }
  0x2f   : > { %p1356_p10 = pneg %p1355_p8  ;;  %p1362_p12 = por %p1361_p1, %p1360_p3 }
  0x31   : > { %p1363_p13 = pnand %p1362_p12, %p1356_p10 }
  0x33   : > { %1366 = shalt.err (!%p1363_p13)
}
  0x34   : > { %1247 = dma.hbm_to_vmem [thread:$0]  (!%p1651_p7), %s1664_s19, 32, %s1668_s21, %s1671_s23  }
  0x35   : > { %s329_s24 = scalar_lea.vmem [#allocation11], %s1110_s22  ;;  %s1706_s20 = sadd.s32 4294967295, %s1545_s8  }
  0x36   : > { %s337_s17 = sshll.u32 %s329_s24, 4  ;;  %s1102_s16 = sadd.s32 4294967294, %s1545_s8   ;;  %s1703_s17 = int_to_ptr.vmem [resolvable:$true] %s337_s17 }
  0x37   : > { %p69_p1 = scmp.ne.s32.totalorder %s1529_s27, %s1525_s26  ;;  %p1993_p3 = scmp.eq.s32.totalorder %s1706_s20, 0 }
  0x38   : > { %p242_p11 = scmp.eq.s32.totalorder %s1706_s20, 1  ;;  %p248_p0 = scmp.eq.s32.totalorder %s1102_s16, 1 }
  0x39   : > { %p1103_p2 = scmp.ge.s32.totalorder %s1545_s8, 1  ;;  %p1716_p4 = por %p1993_p3, %p69_p1 }
  0x3a   : > { %p2012_p5 = scmp.ne.s32.totalorder %s1533_s28, %s1529_s27  ;;  %p1727_p8 = por %p248_p0, %p69_p1 }
  0x3b   : > { %s2011_s19 = scalar_select %p1716_p4, 1, 0 }
  0x3c   : > { %p1723_p6 = por %p242_p11, %p2012_p5  ;;  %p255_p10 = scmp.lt.s32.totalorder %s1545_s8, 3 }
  0x3d   : > { %s2015_s22 = scalar_select %p1727_p8, 1, 0 }
  0x3e   : > { %s2013_s21 = scalar_select %p1723_p6, 1, 0 }
  0x3f   : > { %2016 = sst [smem:[#allocation25_spill]] %s2015_s22  ;;  %p1732_p12 = pnand %p1103_p2, %p255_p10 }
  0x40   : > { %2014 = sst [smem:[#allocation24_spill]] %s2013_s21  ;;  %s1548_s10 = smov [#allocation12]  }
  0x41   : > { %s2017_s9 = scalar_select %p1732_p12, 1, 0 }
  0x42   : > { %s267_s18 = sshll.u32 %s1548_s10, 4  ;;  %p1237_p13 = pneg %p1732_p12  ;;  %s1736_s18 = int_to_ptr.vmem [resolvable:$true] %s267_s18 }
  0x43   : > { %s1751_s1 = scalar_lea.hbm %s1974_s0, %s1107_s13  ;;  %s2019_s6 = sshll.u32 %s1647_s11, 1 }
  0x44   : > { %p1742_p11 = pnand %p1237_p13, %p1993_p3  ;;  %s291_s15 = scalar_lea.vmem [#allocation6], %s2019_s6 }
  0x45   : > { %s299_s28 = sshll.u32 %s291_s15, 4  ;;  %s1367_s26 = scalar_lea.hbm %s1978_s4, 256  ;;  %s1756_s28 = int_to_ptr.vmem [resolvable:$true] %s299_s28 }
  0x46   : > { %p1368_p1 = scmp.ne.s32.totalorder %s1978_s4, %s1367_s26  ;;  %p1369_p0 = pneg %p1742_p11 }
  0x47   : > { %p1374_p10 = scmp.lt.u32.totalorder %s1367_s26, %s1978_s4 }
  0x48   : > { %p1370_p2 = pnand %p1369_p0, %p1368_p1 }
  0x4a   : > { %p1371_p5 = pneg %p1370_p2 }
  0x4c   : > { %p1376_p13 = pnand %p1374_p10, %p1371_p5 }
  0x4e   : > { %1379 = shalt.err (!%p1376_p13)
}
  0x4f   : > { %s1380_s6 = scalar_lea.vmem %s1736_s18, 256  ;;  %p1388_p4 = scmp.lt.s32.totalorder %s1736_s18, %s1736_s18 }
  0x50   : > { %p1381_p3 = scmp.ne.s32.totalorder %s1736_s18, %s1380_s6  ;;  %p1389_p12 = scmp.lt.s32.totalorder %s1380_s6, %s1380_s6 }
  0x52   : > { %p1383_p8 = pnand %p1381_p3, %p1369_p0  ;;  %p1390_p7 = por %p1389_p12, %p1388_p4 }
  0x54   : > { %p1384_p6 = pneg %p1383_p8 }
  0x56   : > { %p1391_p9 = pnand %p1390_p7, %p1384_p6 }
  0x58   : > { %1394 = shalt.err (!%p1391_p9)
}
  0x59   : > { %s1549_s7 = smov 128   ;;  %s1550_s26 = smov 8  }
  0x5a   : > { %1240 = dma.hbm_to_vmem [thread:$0]  (!%p1742_p11), %s1978_s4, 256, %s1736_s18, [#allocation13], %s1549_s7, %s1549_s7, %s1550_s26  }
  0x5b   : > { %s288_s21 = scalar_lea.sflag [#allocation7], %s1647_s11  ;;  %s1395_s22 = scalar_lea.hbm %s1751_s1, 32 }
  0x5c   : > { %p1396_p7 = scmp.ne.s32.totalorder %s1751_s1, %s1395_s22  ;;  %p2020_p9 = scmp.ne.s32.totalorder %s2010_s25, 0 }
  0x5d   : > { %s1400_s13 = scalar_lea.hbm %s1974_s0, 64  ;;  %p1401_p6 = scmp.lt.u32.totalorder %s1751_s1, %s1974_s0 }
  0x5e   : > { %p1398_p3 = pnand %p1396_p7, %p2020_p9  ;;  %p1402_p8 = scmp.lt.u32.totalorder %s1400_s13, %s1395_s22 }
  0x5f   : > { %p1404_p1 = scmp.lt.u32.totalorder %s1395_s22, %s1751_s1 }
  0x60   : > { %p1399_p4 = pneg %p1398_p3  ;;  %p1403_p12 = por %p1402_p8, %p1401_p6 }
  0x62   : > { %p1405_p0 = por %p1404_p1, %p1403_p12 }
  0x64   : > { %p1406_p2 = pnand %p1405_p0, %p1399_p4 }
  0x66   : > { %1409 = shalt.err (!%p1406_p2)
}
  0x67   : > { %s1410_s11 = scalar_lea.vmem %s1756_s28, 32  ;;  %s1551_s18 = smov [#allocation6]  }
  0x68   : > { %p1411_p11 = scmp.ne.s32.totalorder %s1756_s28, %s1410_s11  ;;  %s1415_s24 = sshll.u32 %s1551_s18, 4  ;;  %s1416_s24 = int_to_ptr.vmem [resolvable:$false] %s1415_s24 }
  0x69   : > { %s1417_s10 = scalar_lea.vmem %s1416_s24, 64  ;;  %p1418_p13 = scmp.lt.s32.totalorder %s1756_s28, %s1416_s24 }
  0x6a   : > { %p1413_p5 = pnand %p1411_p11, %p2020_p9  ;;  %p1419_p7 = scmp.lt.s32.totalorder %s1417_s10, %s1410_s11 }
  0x6c   : > { %p1414_p10 = pneg %p1413_p5  ;;  %p1420_p3 = por %p1419_p7, %p1418_p13 }
  0x6e   : > { %p1421_p6 = pnand %p1420_p3, %p1414_p10 }
  0x70   : > { %1424 = shalt.err (!%p1421_p6)
}
  0x71   : > { %p2021_p4 = scmp.ne.s32.totalorder %s2007_s14, 0  ;;  %s2022_s8 = sshll.u32 %s1541_s30, 8 }
  0x72   : > { %s1809_s16 = scalar_lea.hbm %s1976_s2, %s2022_s8  ;;  %s1430_s11 = scalar_lea.hbm %s1976_s2, 512 }
  0x73   : > { %1244 = dma.hbm_to_vmem [thread:$0]  (!%p2021_p4), %s1751_s1, 32, %s1756_s28, %s288_s21  }
  0x74   : > { %s1425_s12 = scalar_lea.hbm %s1809_s16, 256  ;;  %p1431_p0 = scmp.lt.u32.totalorder %s1809_s16, %s1976_s2 }
  0x75   : > { %p1426_p8 = scmp.ne.s32.totalorder %s1809_s16, %s1425_s12  ;;  %p1432_p2 = scmp.lt.u32.totalorder %s1430_s11, %s1425_s12 }
  0x76   : > { %p1434_p5 = scmp.lt.u32.totalorder %s1425_s12, %s1809_s16 }
  0x77   : > { %p1428_p12 = pnand %p1426_p8, %p2020_p9  ;;  %p1433_p11 = por %p1432_p2, %p1431_p0 }
  0x79   : > { %p1429_p1 = pneg %p1428_p12  ;;  %p1435_p10 = por %p1434_p5, %p1433_p11 }
  0x7b   : > { %p1436_p13 = pnand %p1435_p10, %p1429_p1 }
  0x7d   : > { %1439 = shalt.err (!%p1436_p13)
}
  0x7e   : > { %s1440_s21 = scalar_lea.vmem %s1703_s17, 256  ;;  %s1552_s18 = smov [#allocation11]  }
  0x7f   : > { %p1441_p7 = scmp.ne.s32.totalorder %s1703_s17, %s1440_s21  ;;  %s1445_s24 = sshll.u32 %s1552_s18, 4  ;;  %s1446_s24 = int_to_ptr.vmem [resolvable:$false] %s1445_s24 }
  0x80   : > { %s1447_s10 = scalar_lea.vmem %s1446_s24, 512  ;;  %p1448_p8 = scmp.lt.s32.totalorder %s1703_s17, %s1446_s24 }
  0x81   : > { %p1443_p3 = pnand %p1441_p7, %p2020_p9  ;;  %p1449_p12 = scmp.lt.s32.totalorder %s1447_s10, %s1440_s21 }
  0x83   : > { %p1444_p6 = pneg %p1443_p3  ;;  %p1450_p0 = por %p1449_p12, %p1448_p8 }
  0x85   : > { %p1451_p2 = pnand %p1450_p0, %p1444_p6 }
  0x87   : > { %1454 = shalt.err (!%p1451_p2)
}
  0x88   : > { %1250 = dma.hbm_to_vmem [thread:$0]  (!%p2021_p4), %s1809_s16, 256, %s1703_s17, %s1671_s23, %s1549_s7, %s1549_s7, %s1550_s26  }
  0x89   : > { %p2023_p9 = scmp.ne.s32.totalorder %s2017_s9, 0 }
  0x8a   : > { %s1839_s25 = sand.u32 (!%p2023_p9), 1, %s1529_s27   ;;  %p2024_p1 = scmp.ne.s32.totalorder (!%p2023_p9), %s2011_s19, 0 }
  0x8b   : > { %360 = sbr.rel (%p2023_p9) target bundleno = 1049 (0x419), region = 48  ;;  %s1114_s8 = sshll.u32 (!%p2023_p9), %s1839_s25, 1 }
  0x8c   : > { %s363_s15 = scalar_lea.sflag (!%p2023_p9), [#allocation7], %s1839_s25  ;;  %s366_s22 = scalar_lea.vmem (!%p2023_p9), [#allocation6], %s1114_s8 }
  0x92   : > { %1508 = dma.done.wait (%p2024_p1), %s363_s15, 32  }
  0x93   : > { %1510 = vsyncadd (%p2024_p1), %s363_s15, 4294967264  ;;  %s371_s14 = sand.u32 1, %s1706_s20   ;;  %s375_s17 = scalar_lea.vmem [#allocation9], %s1114_s8 }
  0x94   : > { %s372_s23 = scalar_lea.sflag [#allocation10], %s371_s14 }
  0x95   : > { %1512 = dma.done.wait (%p2024_p1), %s372_s23, 288  }
  0x96   : > { %1514 = vsyncadd (%p2024_p1), %s372_s23, 4294967008  ;;  %s1116_s9 = sshll.u32 %s1839_s25, 4  ;;  %p2025_p4 = scmp.eq.s32.totalorder %s1706_s20, 0 }
  0x97   : > { %s1855_s7 = scalar_lea.vmem [#allocation11], %s1116_s9 }
  0x98   : > { %1516 = dma.done.wait (%p2025_p4), [#allocation13], 256   ;;  %p2026_p11 = pmov %p2025_p4 }
  0x99   : > { %v456_v0 = vld [vmem:[%s375_s17] sm:$0x3]  ;;  %v455_v1 = vld [vmem:[%s366_s22] sm:$0x3]  ;;  %vm514_vm0 = vcmask 1041408   ;;  %vm489_vm1 = vcmask 15360   ;;  %v651_v38 = vlaneseq }
  0x9a   : > { %1518 = vsyncadd (%p2026_p11), [#allocation13], 4294967040  ;;  %457 = vxpose.xlu0.b32.start.end [1/1] (short) (narrow) %v456_v0, 64  ;;  %1165 = vmatprep.subr.msk.mxu0 %vm514_vm0, %v455_v1  ;;  %vm449_vm2 = vcmask 516096   ;;  %v1553_v10 = vmov -inf   ;;  %vm452_vm3 = vcmask 523264  }
  0x9b   : > { %1166 = vmatpush3.msk.msra.mxu0 %vm514_vm0, %v455_v1  ;;  %450 = vst.msk [vmem:[#allocation2] sm:$0x1] %vm449_vm2, %v1553_v10  ;;  %v1554_v11 = vmov 0.0   ;;  %v716_v12 = vld [vmem:[%s1855_s7] sm:$0xff]  ;;  %v652_v41 = vshrl.u32 %v651_v38, 7  ;;  %vm833_vm4 = vcmask 130048  }
  0x9c   : > { %451 = vst.msk [vmem:[#allocation3] sm:$0x1] %vm449_vm2, %v1554_v11  ;;  %1195 = vmatprep.mubr.msk.f32.mxu1 %vm452_vm3, %v716_v12  ;;  %p437_p5 = scmp.lt.s32.totalorder %s1537_s29, 1  ;;  %s915_s12 = sld [smem:[#allocation5]] }
  0x9d   : > { %454 = vst.msk [vmem:[#allocation4 + $0x8] sm:$0xff] %vm452_vm3, %v1554_v11  ;;  %453 = vst.msk [vmem:[#allocation4] sm:$0xff] %vm452_vm3, %v1554_v11  ;;  %v1883_v45 = vsub.s32 0, %v652_v41  ;;  %v822_v41 = vld [vmem:[%s1979_s5 + $0x8] sm:$0xff]  ;;  %s2027_s21 = sld [smem:[#allocation24_spill]]  ;;  %s1141_s18 = sshll.u32 %s1537_s29, 8 }
  0x9e   : > { %s438_s13 = scalar_select %p437_p5, %s1537_s29, 1 }
  0x9f   : > { %s436_s24 = scalar_lea.vmem [#allocation14], %s1116_s9  ;;  %s2028_s22 = sld [smem:[#allocation27_spill]] }
  0xa0   : > { %s1140_s6 = sshll.u32 %s438_s13, 4  ;;  %s940_s10 = sshll.u32 %s436_s24, 4  ;;  %s1923_s10 = int_to_ptr.vmem [resolvable:$true] %s940_s10 }
  0xa1   : > { %s444_s28 = scalar_lea.vmem %s1977_s3, %s1140_s6  ;;  %s926_s29 = scalar_lea.sflag [#allocation8], %s1839_s25 }
  0xa2   : > { %v623_v43 = vld [vmem:[#allocation2] sm:$0x1]  ;;  %s1455_s23 = scalar_lea.vmem %s1923_s10, 256  ;;  %s1556_s17 = smov [#allocation14]  }
  0xa3   : > { %p1456_p10 = scmp.ne.s32.totalorder %s1923_s10, %s1455_s23  ;;  %p2029_p13 = scmp.ne.s32.totalorder %s2027_s21, 0 }
  0xa4   : > { %s1459_s9 = sshll.u32 %s1556_s17, 4  ;;  %s1460_s9 = int_to_ptr.vmem [resolvable:$false] %s1459_s9 }
  0xa5   : > { %s1921_s14 = scalar_lea.hbm %s2028_s22, %s1141_s18  ;;  %p1457_p7 = pnand %p1456_p10, %p2029_p13 }
  0xa6   : > { %p1462_p6 = scmp.lt.s32.totalorder %s1923_s10, %s1460_s9 }
  0xa7   : > { %p1458_p3 = pneg %p1457_p7 }
 0x11a   : > { %v473_v2 = vpop.trf.xlu0 }
 0x11b   : > { %1167 = vmatprep.mubr.msk.f32.mxu0 %vm489_vm1, %v473_v2 }
 0x11e   : > { %v474_v3 = vpop.trf.xlu0 }
 0x11f   : > { %1168 = vmatmul.mubr.msk.f32.vlgmr.msra.gmra.mrb[0].mxu0 %vm489_vm1, %v474_v3 }
 0x122   : > { %v475_v4 = vpop.trf.xlu0 }
 0x123   : > { %1170 = vmatprep.mubr.msk.f32.mxu0 %vm489_vm1, %v475_v4 }
 0x126   : > { %v476_v5 = vpop.trf.xlu0 }
 0x127   : > { %1171 = vmatmul.mubr.msk.f32.gmra.mrb[2].mxu0 %vm489_vm1, %v476_v5 }
 0x12a   : > { %v477_v6 = vpop.trf.xlu0 }
 0x12b   : > { %1173 = vmatprep.mubr.msk.f32.mxu0 %vm489_vm1, %v477_v6 }
 0x12e   : > { %v478_v7 = vpop.trf.xlu0 }
 0x12f   : > { %1174 = vmatmul.mubr.msk.f32.gmra.mrb[4].mxu0 %vm489_vm1, %v478_v7 }
 0x132   : > { %v479_v8 = vpop.trf.xlu0 }
 0x133   : > { %1176 = vmatprep.mubr.msk.f32.mxu0 %vm489_vm1, %v479_v8 }
 0x136   : > { %v480_v9 = vpop.trf.xlu0 }
 0x137   : > { %1177 = vmatmul.mubr.msk.f32.gmra.mrb[6].mxu0 %vm489_vm1, %v480_v9 }
 0x1f2   : > { %v1169_v13 = vpop.f32.mrb[0].mxu0 }
 0x1f3   : > { %v584_v14 = vpop.f32.mrb[1].mxu0  ;;  %v626_v18 = vsel %vm452_vm3, %v1169_v13, -inf }
 0x1f4   : > { %v625_v21 = vsel %vm452_vm3, %v584_v14, -inf }
 0x1fa   : > { %v1172_v15 = vpop.f32.mrb[2].mxu0 }
 0x1fb   : > { %v594_v16 = vpop.f32.mrb[3].mxu0  ;;  %v628_v27 = vsel %vm452_vm3, %v1172_v15, -inf }
 0x1fc   : > { %v627_v30 = vsel %vm452_vm3, %v594_v16, -inf }
 0x202   : > { %v1175_v17 = vpop.f32.mrb[4].mxu0 }
 0x203   : > { %v631_v19 = vsel %vm452_vm3, %v1175_v17, -inf  ;;  %v604_v20 = vpop.f32.mrb[5].mxu0 }
 0x204   : > { %v632_v22 = vmax.f32 %v626_v18, %v631_v19  ;;  %v629_v23 = vsel %vm452_vm3, %v604_v20, -inf }
 0x205   : > { %v630_v24 = vmax.f32 %v625_v21, %v629_v23 }
 0x207   : > { %v637_v25 = vmax.f32 %v630_v24, %v632_v22 }
 0x20a   : > { %v1178_v26 = vpop.f32.mrb[6].mxu0 }
 0x20b   : > { %v635_v28 = vsel %vm452_vm3, %v1178_v26, -inf  ;;  %v614_v29 = vpop.f32.mrb[7].mxu0 }
 0x20c   : > { %v636_v31 = vmax.f32 %v628_v27, %v635_v28  ;;  %v633_v32 = vsel %vm452_vm3, %v614_v29, -inf }
 0x20d   : > { %v634_v33 = vmax.f32 %v627_v30, %v633_v32  ;;  %v717_v30 = vld [vmem:[%s1855_s7 + $0x8] sm:$0xff]  ;;  %s1461_s7 = scalar_lea.vmem %s1460_s9, 512 }
 0x20e   : > { %p1463_p8 = scmp.lt.s32.totalorder %s1461_s7, %s1455_s23 }
 0x20f   : > { %v638_v34 = vmax.f32 %v634_v33, %v636_v31 }
 0x210   : > { %p1464_p12 = por %p1463_p8, %p1462_p6 }
 0x211   : > { %v639_v35 = vmax.f32 %v637_v25, %v638_v34 }
 0x212   : > { %p1465_p0 = pnand %p1464_p12, %p1458_p3 }
 0x213   : > { %v640_v36 = vrot.slane %v639_v35, 4 }
 0x215   : > { %v641_v37 = vmax.f32 %v639_v35, %v640_v36  ;;  %v680_v35 = vld [vmem:[#allocation3] sm:$0x1] }
 0x217   : > { %v642_v39 = vrot.slane %v641_v37, 2 }
 0x219   : > { %v643_v40 = vmax.f32 %v641_v37, %v642_v39 }
 0x21b   : > { %v644_v42 = vrot.slane %v643_v40, 1 }
 0x21d   : > { %v645_v44 = vmax.f32 %v643_v40, %v644_v42  ;;  %v819_v40 = vld [vmem:[#allocation12] sm:$0xff] }
 0x21e   : > { %1202 = vmatprep.mubr.msk.f32.mxu0 %vm833_vm4, %v819_v40  ;;  %v821_v42 = vld [vmem:[%s1979_s5] sm:$0xff] }
 0x21f   : > { %v646_v46 = vmax.f32 %v623_v43, %v645_v44 }
 0x221   : > { %v654_v47 = vrot.slane %v646_v46, %v1883_v45  ;;  %803 = vst.msk [vmem:[#allocation2] sm:$0x1] %vm449_vm2, %v646_v46  ;;  %v647_v18 = vsub.f32 %v623_v43, %v646_v46  ;;  %v1555_v43 = vmov 0  }
 0x222   : > { %1316 = vset.pattern.permute.xlu1 %v1555_v43  ;;  %1315 = vset.pattern.permute.xlu0 %v1555_v43 }
 0x223   : > { %v658_v48 = vsub.f32 %v594_v16, %v654_v47  ;;  %v659_v49 = vsub.f32 %v1172_v15, %v654_v47  ;;  %v660_v50 = vsub.f32 %v604_v20, %v654_v47  ;;  %v662_v51 = vsub.f32 %v614_v29, %v654_v47  ;;  %830 = vperm.xlu1 %1316, %v822_v41  }
 0x224   : > { %v656_v52 = vsub.f32 %v584_v14, %v654_v47  ;;  %v657_v53 = vsub.f32 %v1169_v13, %v654_v47  ;;  %v661_v54 = vsub.f32 %v1175_v17, %v654_v47  ;;  %v663_v55 = vsub.f32 %v1178_v26, %v654_v47  ;;  %825 = vperm.xlu0 %1315, %v821_v42   ;;  %v707_v47 = vld [vmem:[#allocation4 + $0x8] sm:$0xff] }
 0x225   : > { %v668_v56 = vmul.f32 1.442695, %v658_v48  ;;  %v670_v57 = vmul.f32 1.442695, %v659_v49  ;;  %v676_v58 = vmul.f32 1.442695, %v662_v51 }
 0x226   : > { %v664_v59 = vmul.f32 1.442695, %v656_v52  ;;  %v666_v60 = vmul.f32 1.442695, %v657_v53  ;;  %v672_v61 = vmul.f32 1.442695, %v660_v50 }
 0x227   : > { %1317 = vpow2.f32 %v668_v56  ;;  %v674_v62 = vmul.f32 1.442695, %v661_v54  ;;  %v678_v63 = vmul.f32 1.442695, %v663_v55  ;;  %v648_v23 = vmul.f32 1.442695, %v647_v18 }
 0x228   : > { %1319 = vpow2.f32 %v670_v57  ;;  %v706_v48 = vld [vmem:[#allocation4] sm:$0xff] }
 0x229   : > { %1321 = vpow2.f32 %v676_v58 }
 0x22a   : > { %1323 = vpow2.f32 %v664_v59 }
 0x22b   : > { %1325 = vpow2.f32 %v666_v60 }
 0x22c   : > { %1327 = vpow2.f32 %v672_v61 }
 0x22d   : > { %1329 = vpow2.f32 %v674_v62  ;;  %v820_v62 = vld [vmem:[#allocation12 + $0x8] sm:$0xff] }
 0x22e   : > { %1331 = vpow2.f32 %v678_v63 }
 0x22f   : > { %1333 = vpow2.f32 %v648_v23 }
 0x231   : > { %v1318_v0 = vpop.eup %1317 }
 0x232   : > { %v1320_v1 = vpop.eup %1319  ;;  %v685_v13 = vsel %vm452_vm3, %v1318_v0, 0.0 }
 0x233   : > { %v1322_v2 = vpop.eup %1321  ;;  %v1209_v3 = vpack.c.bf16 %v1320_v1, %v1318_v0  ;;  %v687_v17 = vsel %vm452_vm3, %v1320_v1, 0.0  ;;  %v916_v1 = vstv %s915_s12 }
 0x234   : > { %v1324_v4 = vpop.eup %1323  ;;  %v693_v25 = vsel %vm452_vm3, %v1322_v2, 0.0 }
 0x235   : > { %v1326_v5 = vpop.eup %1325  ;;  %v682_v6 = vsel %vm452_vm3, %v1324_v4, 0.0 }
 0x236   : > { %v1328_v7 = vpop.eup %1327  ;;  %v683_v8 = vsel %vm452_vm3, %v1326_v5, 0.0  ;;  %v1205_v9 = vpack.c.bf16 %v1326_v5, %v1324_v4  ;;  %v920_v4 = vld [vmem:[%s444_s28 + $0x8] sm:$0xff] }
 0x237   : > { %v1330_v10 = vpop.eup %1329  ;;  %v684_v11 = vadd.f32 %v683_v8, %v682_v6  ;;  %v689_v20 = vsel %vm452_vm3, %v1328_v7, 0.0 }
 0x238   : > { %v1332_v12 = vpop.eup %1331  ;;  %1206 = vmatprep.subr.bf16.mxu1 %v1205_v9  ;;  %v1213_v14 = vpack.c.bf16 %v1330_v10, %v1328_v7  ;;  %v691_v22 = vsel %vm452_vm3, %v1330_v10, 0.0  ;;  %v919_v7 = vld [vmem:[%s444_s28] sm:$0xff] }
 0x239   : > { %v686_v15 = vadd.f32 %v685_v13, %v684_v11  ;;  %1208 = vmatpush3.bf16.msra.mxu1 %v1205_v9  ;;  %v1217_v16 = vpack.c.bf16 %v1332_v12, %v1322_v2  ;;  %v695_v27 = vsel %vm452_vm3, %v1332_v12, 0.0  ;;  %v1334_v34 = vpop.eup %1333 }
 0x23a   : > { %1210 = vmatprep.subr.bf16.mxu1 %v1209_v3  ;;  %v681_v38 = vmul.f32 %v1334_v34, %v680_v35  ;;  %v712_v46 = vrot.slane %v1334_v34, %v1883_v45 }
 0x23b   : > { %v688_v19 = vadd.f32 %v687_v17, %v686_v15 }
 0x23c   : > { %v715_v49 = vmul.f32 %v712_v46, %v707_v47  ;;  %v714_v51 = vmul.f32 %v712_v46, %v706_v48 }
 0x23d   : > { %v690_v21 = vadd.f32 %v689_v20, %v688_v19  ;;  %1212 = vmatpush3.bf16.msra.mxu1 %v1209_v3 }
 0x23e   : > { %1214 = vmatprep.subr.bf16.mxu1 %v1213_v14 }
 0x23f   : > { %v692_v24 = vadd.f32 %v691_v22, %v690_v21 }
 0x241   : > { %v694_v26 = vadd.f32 %v693_v25, %v692_v24  ;;  %1216 = vmatpush3.bf16.msra.mxu1 %v1213_v14 }
 0x242   : > { %1218 = vmatprep.subr.bf16.mxu1 %v1217_v16 }
 0x243   : > { %v696_v28 = vadd.f32 %v695_v27, %v694_v26 }
 0x245   : > { %v697_v29 = vrot.slane %v696_v28, 4  ;;  %1220 = vmatpush3.bf16.msra.mxu1 %v1217_v16 }
 0x247   : > { %v698_v31 = vadd.f32 %v697_v29, %v696_v28 }
 0x248   : > { %1196 = vmatmul.mubr.msk.f32.vlgmr.msra.gmra.mrb[0].mxu1 %vm452_vm3, %v717_v30 }
 0x249   : > { %v699_v32 = vrot.slane %v698_v31, 2 }
 0x24b   : > { %v700_v33 = vadd.f32 %v699_v32, %v698_v31 }
 0x24d   : > { %v701_v36 = vrot.slane %v700_v33, 1 }
 0x24f   : > { %v702_v37 = vadd.f32 %v701_v36, %v700_v33 }
 0x251   : > { %v703_v39 = vadd.f32 %v702_v37, %v681_v38 }
 0x253   : > { %705 = vst.msk [vmem:[#allocation3] sm:$0x1] %vm449_vm2, %v703_v39 }
 0x25a   : > { %v807_v44 = vld [vmem:[#allocation3] sm:$0x1] }
 0x25b   : > { %1335 = vrcp.f32 %v807_v44 }
 0x265   : > { %v1336_v55 = vpop.eup %1335 }
 0x266   : > { %v815_v56 = vrot.slane %v1336_v55, %v1883_v45 }
 0x2a2   : > { %v831_v63 = vpop.permute.xlu1 %830 }
 0x2a3   : > { %v826_v45 = vpop.permute.xlu0 %825 }
 0x31b   : > { %v1197_v50 = vpop.f32.mrb[0].mxu1 }
 0x31c   : > { %v800_v52 = vadd.f32 %v1197_v50, %v715_v49  ;;  %v790_v53 = vpop.f32.mrb[1].mxu1 }
 0x31d   : > { %v799_v54 = vadd.f32 %v790_v53, %v714_v51 }
 0x31e   : > { %802 = vst.msk [vmem:[#allocation4 + $0x8] sm:$0xff] %vm452_vm3, %v800_v52 }
 0x31f   : > { %801 = vst.msk [vmem:[#allocation4] sm:$0xff] %vm452_vm3, %v799_v54 }
 0x325   : > { %v810_v57 = vld [vmem:[#allocation4 + $0x8] sm:$0xff] }
 0x326   : > { %v809_v58 = vld [vmem:[#allocation4] sm:$0xff]  ;;  %v818_v59 = vmul.f32 %v815_v56, %v810_v57 }
 0x327   : > { %v817_v60 = vmul.f32 %v815_v56, %v809_v58 }
 0x329   : > { %v1221_v61 = vpack.c.bf16 %v818_v59, %v817_v60 }
 0x32b   : > { %1222 = vmatprep.subr.bf16.mxu0 %v1221_v61 }
 0x32c   : > { %1224 = vmatpush3.bf16.msra.mxu0 %v1221_v61 }
 0x32f   : > { %1203 = vmatmul.mubr.msk.f32.vlgmr.msra.gmra.mrb[8].mxu0 %vm833_vm4, %v820_v62 }
 0x402   : > { %v1204_v0 = vpop.f32.mrb[8].mxu0 }
 0x403   : > { %v912_v2 = vadd.f32 %v1204_v0, %v831_v63  ;;  %v906_v3 = vpop.f32.mrb[9].mxu0 }
 0x404   : > { %v907_v5 = vadd.f32 %v906_v3, %v826_v45 }
 0x405   : > { %v918_v6 = vmul.f32 %v916_v1, %v912_v2 }
 0x406   : > { %v917_v8 = vmul.f32 %v916_v1, %v907_v5 }
 0x407   : > { %v922_v9 = vadd.f32 %v920_v4, %v918_v6 }
 0x408   : > { %v921_v10 = vadd.f32 %v919_v7, %v917_v8 }
 0x409   : > { %924 = vst.msk [vmem:[%s436_s24 + $0x8] sm:$0xff] %vm452_vm3, %v922_v9 }
 0x40a   : > { %923 = vst.msk [vmem:[%s436_s24] sm:$0xff] %vm452_vm3, %v921_v10 }
 0x40b   : > { %1468 = shalt.err (!%p1465_p0)
}
 0x40c   : > { %s1469_s20 = scalar_lea.hbm %s1921_s14, 256  ;;  %s1473_s16 = scalar_lea.hbm %s2028_s22, 512 }
 0x40d   : > { %p1470_p2 = scmp.ne.s32.totalorder %s1921_s14, %s1469_s20  ;;  %p1474_p4 = scmp.lt.u32.totalorder %s1921_s14, %s2028_s22 }
 0x40e   : > { %p1475_p11 = scmp.lt.u32.totalorder %s1473_s16, %s1469_s20  ;;  %p1477_p10 = scmp.lt.u32.totalorder %s1469_s20, %s1921_s14 }
 0x40f   : > { %p1471_p9 = pnand %p1470_p2, %p2029_p13 }
 0x410   : > { %p1476_p5 = por %p1475_p11, %p1474_p4 }
 0x411   : > { %p1472_p1 = pneg %p1471_p9 }
 0x412   : > { %p1478_p7 = por %p1477_p10, %p1476_p5 }
 0x414   : > { %p1479_p3 = pnand %p1478_p7, %p1472_p1 }
 0x416   : > { %1482 = shalt.err (!%p1479_p3)
}
 0x417   : > { %s1557_s6 = smov 128   ;;  %s1558_s11 = smov 8  }
 0x418   : > { %1235 = dma.vmem_to_hbm [thread:$0]  (%p2029_p13), %s1923_s10, 256, %s1921_s14, %s926_s29, %s1557_s6, %s1557_s6, %s1558_s11  }
 0x419 PF: > { %s2030_s1 = sld [smem:[#allocation19_spill]]  ;;  %s2031_s28 = sld [smem:[#allocation25_spill]] }
 0x41a   : > { %s2032_s18 = sld [smem:[#allocation21_spill]] }
 0x41f   : > { %s955_s24 = sand.u32 1, %s2030_s1   ;;  %p2033_p6 = scmp.ne.s32.totalorder %s2031_s28, 0 }
 0x420   : > { %p2034_p8 = scmp.ge.s32.totalorder %s2032_s18, 2  ;;  %s956_s8 = scalar_lea.sflag [#allocation8], %s955_s24 }
 0x422   : > { %p1252_p12 = pnand %p2034_p8, %p2033_p6 }
 0x424   : > { %1520 = dma.done.wait (!%p1252_p12), %s956_s8, 256  }
 0x425   : > { %1522 = vsyncadd (!%p1252_p12), %s956_s8, 4294967040  ;;  %s28_s8 = sadd.s32 1, %s2032_s18   ;;  %s2035_s15 = sld [smem:[#allocation20_spill]] }
 0x426   : > { %p25_p0 = scmp.ge.s32.totalorder %s28_s8, 4   ;;  %s2036_s28 = sld [smem:[#allocation23_spill]] }
 0x427   : > { %s2037_s25 = sld [smem:[#allocation22_spill]]  ;;  %s2038_s26 = smov %s1529_s27 }
 0x428   : > { %s2040_s29 = smov %s1541_s30  ;;  %27 = sbr.rel (!%p25_p0) target bundleno = 13 (0xd), region = 132 }
 0x42b   : > { %s2039_s27 = smov %s2035_s15 }
 0x42d   : > { %s2041_s30 = smov %s2037_s25 }
 0x42f   :  { %961 = vsyncpa [#allocation7], 1 }
 0x430   :  { %963 = vsyncpa [#allocation7 + $0x1], 1 }
 0x431   :  { %964 = vsyncpa [#allocation10], 1 }
 0x432   :  { %966 = vsyncpa [#allocation10 + $0x1], 1 }
 0x433   :  { %967 = vsyncpa [#allocation13], 1 }
 0x434   :  { %968 = vsyncpa [#allocation8], 1 }
 0x435   :  { %970 = vsyncpa [#allocation8 + $0x1], 1 }

// kernel: tpu_custom_call.1
= control target key start
LH: loop header
LB: loop body
LE: loop exit
PB: predicated region body
PF: predicated region fallthrough
CT: control target
= control target key end

     0   :  { %s1974_s0 = inlined_call_operand.hbm [shape: f32[2,2,64], index: 0, kind: input, shape index: {}]   ;;  %s1975_s1 = inlined_call_operand.hbm [shape: f32[2,2,64], index: 1, kind: input, shape index: {}]   ;;  %s1976_s2 = inlined_call_operand.hbm [shape: f32[2,16,64], index: 2, kind: input, shape index: {}]   ;;  %s1977_s3 = inlined_call_operand.vmem [shape: f32[2,16,64], index: 3, kind: input, shape index: {}]   ;;  %s1978_s4 = inlined_call_operand.hbm [shape: f32[16,16], index: 4, kind: input, shape index: {}]   ;;  %s1979_s5 = inlined_call_operand.vmem [shape: f32[16,1], index: 5, kind: input, shape index: {}]   ;;  %s1980_s6 = inlined_call_operand.<no memory space> [shape: f32[1,1], index: 6, kind: input, shape index: {}]   ;;  %s1981_s7 = inlined_call_operand.hbm [shape: f32[2,16,64], index: 7, kind: output, shape index: {}]  }
   0x1   :  { %2001 = sst [smem:[#allocation26_spill]] %s1975_s1 }
   0x2   :  { %2002 = sst [smem:[#allocation27_spill]] %s1981_s7 }
   0x3   :  { %12 = sst [smem:[#allocation5]] %s1980_s6 }
   0x4   :  { %13 = vsyncpa [#allocation7], 0 }
   0x5   :  { %15 = vsyncpa [#allocation7 + $0x1], 0 }
   0x6   :  { %16 = vsyncpa [#allocation10], 0 }
   0x7   :  { %18 = vsyncpa [#allocation10 + $0x1], 0 }
   0x8   :  { %19 = vsyncpa [#allocation13], 0 }
   0x9   :  { %20 = vsyncpa [#allocation8], 0 }
   0xa   :  { %22 = vsyncpa [#allocation8 + $0x1], 0  ;;  %s1602_s26 = smov 0   ;;  %s1604_s27 = smov 0  }
   0xb   :  { %s1606_s28 = smov 0   ;;  %s1608_s29 = smov 0  }
   0xc   :  { %s1610_s30 = smov 0   ;;  %s1612_s8 = smov 0  }
   0xd LB: > { %2003 = sst [smem:[#allocation19_spill]] %s1525_s26  ;;  %s47_s6 = sadd.s32 1, %s1541_s30  ;;  %s1545_s8 = sphi %s1612_s8, %s28_s8   ;;  %s1541_s30 = sphi %s1610_s30, %s2041_s30   ;;  %s1537_s29 = sphi %s1608_s29, %s2040_s29   ;;  %s1533_s28 = sphi %s1606_s28, %s2036_s28   ;;  %s1529_s27 = sphi %s1604_s27, %s2039_s27   ;;  %s1525_s26 = sphi %s1602_s26, %s2038_s26  }
   0xe   : > { %2004 = sst [smem:[#allocation20_spill]] %s1533_s28  ;;  %s56_s9 = sadd.s32 1, %s1533_s28 }
   0xf   : > { %2005 = sst [smem:[#allocation21_spill]] %s1545_s8  ;;  %p49_p0 = scmp.ge.s32.totalorder %s47_s6, 2 }
  0x10   : > { %p1982_p1 = scmp.ne.s32.totalorder %s1533_s28, %s1529_s27  ;;  %p64_p2 = scmp.eq.s32.totalorder %s1545_s8, 0 }
  0x11   : > { %s2043_s6 = smov (%p49_p0, %s47_s6), 0  ;;  %p1256_p5 = scmp.lt.s32.totalorder %s1545_s8, 2 }
  0x12   : > { %2006 = sst [smem:[#allocation22_spill]] %s2043_s6  ;;  %p65_p4 = por %p64_p2, %p1982_p1 }
  0x13   : > { %s51_s10 = ssub.s32 %s1541_s30, %s2043_s6  ;;  %s1647_s11 = sand.u32 1, %s1533_s28  }
  0x14   : > { %p54_p6 = scmp.eq.s32.totalorder %s51_s10, 0  ;;  %s1983_s12 = sshll.u32 %s1647_s11, 1 }
  0x15   : > { %s1107_s13 = sshll.u32 %s1541_s30, 5  ;;  %p1651_p7 = pnand %p1256_p5, %p65_p4 }
  0x16   : > { %s1656_s15 = scalar_select %p54_p6, %s1533_s28, %s56_s9  }
  0x17   : > { %s2007_s14 = scalar_select %p1651_p7, 1, 0 }
  0x18   : > { %2008 = sst [smem:[#allocation23_spill]] %s1656_s15  ;;  %s306_s16 = sand.u32 1, %s1545_s8  }
  0x19   : > { %s2009_s1 = sld [smem:[#allocation26_spill]]  ;;  %s310_s20 = scalar_lea.vmem [#allocation9], %s1983_s12 }
  0x1a   : > { %s318_s21 = sshll.u32 %s310_s20, 4  ;;  %s1110_s22 = sshll.u32 %s1647_s11, 4  ;;  %s1668_s21 = int_to_ptr.vmem [resolvable:$true] %s318_s21 }
  0x1b   : > { %s1671_s23 = scalar_lea.sflag [#allocation10], %s306_s16  ;;  %p1677_p9 = pneg %p1651_p7 }
  0x1d   : > { %s2010_s25 = scalar_select %p1677_p9, 1, 0 }
  0x1f   : > { %s1664_s19 = scalar_lea.hbm %s2009_s1, %s1107_s13  ;;  %s1342_s17 = scalar_lea.hbm %s2009_s1, 64 }
  0x20   : > { %s1337_s24 = scalar_lea.hbm %s1664_s19, 32  ;;  %p1343_p12 = scmp.lt.u32.totalorder %s1664_s19, %s2009_s1 }
  0x21   : > { %p1338_p8 = scmp.ne.s32.totalorder %s1664_s19, %s1337_s24  ;;  %p1344_p13 = scmp.lt.u32.totalorder %s1342_s17, %s1337_s24 }
  0x22   : > { %p1346_p2 = scmp.lt.u32.totalorder %s1337_s24, %s1664_s19 }
  0x23   : > { %p1340_p10 = pnand %p1677_p9, %p1338_p8  ;;  %p1345_p0 = por %p1344_p13, %p1343_p12 }
  0x25   : > { %p1341_p11 = pneg %p1340_p10  ;;  %p1347_p4 = por %p1346_p2, %p1345_p0 }
  0x27   : > { %p1348_p5 = pnand %p1347_p4, %p1341_p11 }
  0x29   : > { %1351 = shalt.err (!%p1348_p5)
}
  0x2a   : > { %s1352_s16 = scalar_lea.vmem %s1668_s21, 32  ;;  %s1547_s9 = smov [#allocation9]  }
  0x2b   : > { %p1353_p6 = scmp.ne.s32.totalorder %s1668_s21, %s1352_s16  ;;  %s1357_s10 = sshll.u32 %s1547_s9, 4  ;;  %s1358_s10 = int_to_ptr.vmem [resolvable:$false] %s1357_s10 }
  0x2c   : > { %s1359_s18 = scalar_lea.vmem %s1358_s10, 64  ;;  %p1360_p3 = scmp.lt.s32.totalorder %s1668_s21, %s1358_s10 }
  0x2d   : > { %p1355_p8 = pnand %p1353_p6, %p1677_p9  ;;  %p1361_p1 = scmp.lt.s32.totalorder %s1359_s18, %s1352_s16 }
  0x2f   : > { %p1356_p10 = pneg %p1355_p8  ;;  %p1362_p12 = por %p1361_p1, %p1360_p3 }
  0x31   : > { %p1363_p13 = pnand %p1362_p12, %p1356_p10 }
  0x33   : > { %1366 = shalt.err (!%p1363_p13)
}
  0x34   : > { %1247 = dma.hbm_to_vmem [thread:$0]  (!%p1651_p7), %s1664_s19, 32, %s1668_s21, %s1671_s23  }
  0x35   : > { %s329_s24 = scalar_lea.vmem [#allocation11], %s1110_s22  ;;  %s1706_s20 = sadd.s32 4294967295, %s1545_s8  }
  0x36   : > { %s337_s17 = sshll.u32 %s329_s24, 4  ;;  %s1102_s16 = sadd.s32 4294967294, %s1545_s8   ;;  %s1703_s17 = int_to_ptr.vmem [resolvable:$true] %s337_s17 }
  0x37   : > { %p69_p1 = scmp.ne.s32.totalorder %s1529_s27, %s1525_s26  ;;  %p1993_p3 = scmp.eq.s32.totalorder %s1706_s20, 0 }
  0x38   : > { %p242_p11 = scmp.eq.s32.totalorder %s1706_s20, 1  ;;  %p248_p0 = scmp.eq.s32.totalorder %s1102_s16, 1 }
  0x39   : > { %p1103_p2 = scmp.ge.s32.totalorder %s1545_s8, 1  ;;  %p1716_p4 = por %p1993_p3, %p69_p1 }
  0x3a   : > { %p2012_p5 = scmp.ne.s32.totalorder %s1533_s28, %s1529_s27  ;;  %p1727_p8 = por %p248_p0, %p69_p1 }
  0x3b   : > { %s2011_s19 = scalar_select %p1716_p4, 1, 0 }
  0x3c   : > { %p1723_p6 = por %p242_p11, %p2012_p5  ;;  %p255_p10 = scmp.lt.s32.totalorder %s1545_s8, 3 }
  0x3d   : > { %s2015_s22 = scalar_select %p1727_p8, 1, 0 }
  0x3e   : > { %s2013_s21 = scalar_select %p1723_p6, 1, 0 }
  0x3f   : > { %2016 = sst [smem:[#allocation25_spill]] %s2015_s22  ;;  %p1732_p12 = pnand %p1103_p2, %p255_p10 }
  0x40   : > { %2014 = sst [smem:[#allocation24_spill]] %s2013_s21  ;;  %s1548_s10 = smov [#allocation12]  }
  0x41   : > { %s2017_s9 = scalar_select %p1732_p12, 1, 0 }
  0x42   : > { %s267_s18 = sshll.u32 %s1548_s10, 4  ;;  %p1237_p13 = pneg %p1732_p12  ;;  %s1736_s18 = int_to_ptr.vmem [resolvable:$true] %s267_s18 }
  0x43   : > { %s1751_s1 = scalar_lea.hbm %s1974_s0, %s1107_s13  ;;  %s2019_s6 = sshll.u32 %s1647_s11, 1 }
  0x44   : > { %p1742_p11 = pnand %p1237_p13, %p1993_p3  ;;  %s291_s15 = scalar_lea.vmem [#allocation6], %s2019_s6 }
  0x45   : > { %s299_s28 = sshll.u32 %s291_s15, 4  ;;  %s1367_s26 = scalar_lea.hbm %s1978_s4, 256  ;;  %s1756_s28 = int_to_ptr.vmem [resolvable:$true] %s299_s28 }
  0x46   : > { %p1368_p1 = scmp.ne.s32.totalorder %s1978_s4, %s1367_s26  ;;  %p1369_p0 = pneg %p1742_p11 }
  0x47   : > { %p1374_p10 = scmp.lt.u32.totalorder %s1367_s26, %s1978_s4 }
  0x48   : > { %p1370_p2 = pnand %p1369_p0, %p1368_p1 }
  0x4a   : > { %p1371_p5 = pneg %p1370_p2 }
  0x4c   : > { %p1376_p13 = pnand %p1374_p10, %p1371_p5 }
  0x4e   : > { %1379 = shalt.err (!%p1376_p13)
}
  0x4f   : > { %s1380_s6 = scalar_lea.vmem %s1736_s18, 256  ;;  %p1388_p4 = scmp.lt.s32.totalorder %s1736_s18, %s1736_s18 }
  0x50   : > { %p1381_p3 = scmp.ne.s32.totalorder %s1736_s18, %s1380_s6  ;;  %p1389_p12 = scmp.lt.s32.totalorder %s1380_s6, %s1380_s6 }
  0x52   : > { %p1383_p8 = pnand %p1381_p3, %p1369_p0  ;;  %p1390_p7 = por %p1389_p12, %p1388_p4 }
  0x54   : > { %p1384_p6 = pneg %p1383_p8 }
  0x56   : > { %p1391_p9 = pnand %p1390_p7, %p1384_p6 }
  0x58   : > { %1394 = shalt.err (!%p1391_p9)
}
  0x59   : > { %s1549_s7 = smov 128   ;;  %s1550_s26 = smov 8  }
  0x5a   : > { %1240 = dma.hbm_to_vmem [thread:$0]  (!%p1742_p11), %s1978_s4, 256, %s1736_s18, [#allocation13], %s1549_s7, %s1549_s7, %s1550_s26  }
  0x5b   : > { %s288_s21 = scalar_lea.sflag [#allocation7], %s1647_s11  ;;  %s1395_s22 = scalar_lea.hbm %s1751_s1, 32 }
  0x5c   : > { %p1396_p7 = scmp.ne.s32.totalorder %s1751_s1, %s1395_s22  ;;  %p2020_p9 = scmp.ne.s32.totalorder %s2010_s25, 0 }
  0x5d   : > { %s1400_s13 = scalar_lea.hbm %s1974_s0, 64  ;;  %p1401_p6 = scmp.lt.u32.totalorder %s1751_s1, %s1974_s0 }
  0x5e   : > { %p1398_p3 = pnand %p1396_p7, %p2020_p9  ;;  %p1402_p8 = scmp.lt.u32.totalorder %s1400_s13, %s1395_s22 }
  0x5f   : > { %p1404_p1 = scmp.lt.u32.totalorder %s1395_s22, %s1751_s1 }
  0x60   : > { %p1399_p4 = pneg %p1398_p3  ;;  %p1403_p12 = por %p1402_p8, %p1401_p6 }
  0x62   : > { %p1405_p0 = por %p1404_p1, %p1403_p12 }
  0x64   : > { %p1406_p2 = pnand %p1405_p0, %p1399_p4 }
  0x66   : > { %1409 = shalt.err (!%p1406_p2)
}
  0x67   : > { %s1410_s11 = scalar_lea.vmem %s1756_s28, 32  ;;  %s1551_s18 = smov [#allocation6]  }
  0x68   : > { %p1411_p11 = scmp.ne.s32.totalorder %s1756_s28, %s1410_s11  ;;  %s1415_s24 = sshll.u32 %s1551_s18, 4  ;;  %s1416_s24 = int_to_ptr.vmem [resolvable:$false] %s1415_s24 }
  0x69   : > { %s1417_s10 = scalar_lea.vmem %s1416_s24, 64  ;;  %p1418_p13 = scmp.lt.s32.totalorder %s1756_s28, %s1416_s24 }
  0x6a   : > { %p1413_p5 = pnand %p1411_p11, %p2020_p9  ;;  %p1419_p7 = scmp.lt.s32.totalorder %s1417_s10, %s1410_s11 }
  0x6c   : > { %p1414_p10 = pneg %p1413_p5  ;;  %p1420_p3 = por %p1419_p7, %p1418_p13 }
  0x6e   : > { %p1421_p6 = pnand %p1420_p3, %p1414_p10 }
  0x70   : > { %1424 = shalt.err (!%p1421_p6)
}
  0x71   : > { %p2021_p4 = scmp.ne.s32.totalorder %s2007_s14, 0  ;;  %s2022_s8 = sshll.u32 %s1541_s30, 8 }
  0x72   : > { %s1809_s16 = scalar_lea.hbm %s1976_s2, %s2022_s8  ;;  %s1430_s11 = scalar_lea.hbm %s1976_s2, 512 }
  0x73   : > { %1244 = dma.hbm_to_vmem [thread:$0]  (!%p2021_p4), %s1751_s1, 32, %s1756_s28, %s288_s21  }
  0x74   : > { %s1425_s12 = scalar_lea.hbm %s1809_s16, 256  ;;  %p1431_p0 = scmp.lt.u32.totalorder %s1809_s16, %s1976_s2 }
  0x75   : > { %p1426_p8 = scmp.ne.s32.totalorder %s1809_s16, %s1425_s12  ;;  %p1432_p2 = scmp.lt.u32.totalorder %s1430_s11, %s1425_s12 }
  0x76   : > { %p1434_p5 = scmp.lt.u32.totalorder %s1425_s12, %s1809_s16 }
  0x77   : > { %p1428_p12 = pnand %p1426_p8, %p2020_p9  ;;  %p1433_p11 = por %p1432_p2, %p1431_p0 }
  0x79   : > { %p1429_p1 = pneg %p1428_p12  ;;  %p1435_p10 = por %p1434_p5, %p1433_p11 }
  0x7b   : > { %p1436_p13 = pnand %p1435_p10, %p1429_p1 }
  0x7d   : > { %1439 = shalt.err (!%p1436_p13)
}
  0x7e   : > { %s1440_s21 = scalar_lea.vmem %s1703_s17, 256  ;;  %s1552_s18 = smov [#allocation11]  }
  0x7f   : > { %p1441_p7 = scmp.ne.s32.totalorder %s1703_s17, %s1440_s21  ;;  %s1445_s24 = sshll.u32 %s1552_s18, 4  ;;  %s1446_s24 = int_to_ptr.vmem [resolvable:$false] %s1445_s24 }
  0x80   : > { %s1447_s10 = scalar_lea.vmem %s1446_s24, 512  ;;  %p1448_p8 = scmp.lt.s32.totalorder %s1703_s17, %s1446_s24 }
  0x81   : > { %p1443_p3 = pnand %p1441_p7, %p2020_p9  ;;  %p1449_p12 = scmp.lt.s32.totalorder %s1447_s10, %s1440_s21 }
  0x83   : > { %p1444_p6 = pneg %p1443_p3  ;;  %p1450_p0 = por %p1449_p12, %p1448_p8 }
  0x85   : > { %p1451_p2 = pnand %p1450_p0, %p1444_p6 }
  0x87   : > { %1454 = shalt.err (!%p1451_p2)
}
  0x88   : > { %1250 = dma.hbm_to_vmem [thread:$0]  (!%p2021_p4), %s1809_s16, 256, %s1703_s17, %s1671_s23, %s1549_s7, %s1549_s7, %s1550_s26  }
  0x89   : > { %p2023_p9 = scmp.ne.s32.totalorder %s2017_s9, 0 }
  0x8a   : > { %s1839_s25 = sand.u32 (!%p2023_p9), 1, %s1529_s27   ;;  %p2024_p1 = scmp.ne.s32.totalorder (!%p2023_p9), %s2011_s19, 0 }
  0x8b   : > { %360 = sbr.rel (%p2023_p9) target bundleno = 1049 (0x419), region = 48  ;;  %s1114_s8 = sshll.u32 (!%p2023_p9), %s1839_s25, 1 }
  0x8c   : > { %s363_s15 = scalar_lea.sflag (!%p2023_p9), [#allocation7], %s1839_s25  ;;  %s366_s22 = scalar_lea.vmem (!%p2023_p9), [#allocation6], %s1114_s8 }
  0x92   : > { %1508 = dma.done.wait (%p2024_p1), %s363_s15, 32  }
  0x93   : > { %1510 = vsyncadd (%p2024_p1), %s363_s15, 4294967264  ;;  %s371_s14 = sand.u32 1, %s1706_s20   ;;  %s375_s17 = scalar_lea.vmem [#allocation9], %s1114_s8 }
  0x94   : > { %s372_s23 = scalar_lea.sflag [#allocation10], %s371_s14 }
  0x95   : > { %1512 = dma.done.wait (%p2024_p1), %s372_s23, 288  }
  0x96   : > { %1514 = vsyncadd (%p2024_p1), %s372_s23, 4294967008  ;;  %s1116_s9 = sshll.u32 %s1839_s25, 4  ;;  %p2025_p4 = scmp.eq.s32.totalorder %s1706_s20, 0 }
  0x97   : > { %s1855_s7 = scalar_lea.vmem [#allocation11], %s1116_s9 }
  0x98   : > { %1516 = dma.done.wait (%p2025_p4), [#allocation13], 256   ;;  %p2026_p11 = pmov %p2025_p4 }
  0x99   : > { %v456_v0 = vld [vmem:[%s375_s17] sm:$0x3]  ;;  %v455_v1 = vld [vmem:[%s366_s22] sm:$0x3]  ;;  %vm514_vm0 = vcmask 1041408   ;;  %vm489_vm1 = vcmask 15360   ;;  %v651_v38 = vlaneseq }
  0x9a   : > { %1518 = vsyncadd (%p2026_p11), [#allocation13], 4294967040  ;;  %457 = vxpose.xlu0.b32.start.end [1/1] (short) (narrow) %v456_v0, 64  ;;  %1165 = vmatprep.subr.msk.mxu0 %vm514_vm0, %v455_v1  ;;  %vm449_vm2 = vcmask 516096   ;;  %v1553_v10 = vmov -inf   ;;  %vm452_vm3 = vcmask 523264  }
  0x9b   : > { %1166 = vmatpush3.msk.msra.mxu0 %vm514_vm0, %v455_v1  ;;  %450 = vst.msk [vmem:[#allocation2] sm:$0x1] %vm449_vm2, %v1553_v10  ;;  %v1554_v11 = vmov 0.0   ;;  %v716_v12 = vld [vmem:[%s1855_s7] sm:$0xff]  ;;  %v652_v41 = vshrl.u32 %v651_v38, 7  ;;  %vm833_vm4 = vcmask 130048  }
  0x9c   : > { %451 = vst.msk [vmem:[#allocation3] sm:$0x1] %vm449_vm2, %v1554_v11  ;;  %1195 = vmatprep.mubr.msk.f32.mxu1 %vm452_vm3, %v716_v12  ;;  %p437_p5 = scmp.lt.s32.totalorder %s1537_s29, 1  ;;  %s915_s12 = sld [smem:[#allocation5]] }
  0x9d   : > { %454 = vst.msk [vmem:[#allocation4 + $0x8] sm:$0xff] %vm452_vm3, %v1554_v11  ;;  %453 = vst.msk [vmem:[#allocation4] sm:$0xff] %vm452_vm3, %v1554_v11  ;;  %v1883_v45 = vsub.s32 0, %v652_v41  ;;  %v822_v41 = vld [vmem:[%s1979_s5 + $0x8] sm:$0xff]  ;;  %s2027_s21 = sld [smem:[#allocation24_spill]]  ;;  %s1141_s18 = sshll.u32 %s1537_s29, 8 }
  0x9e   : > { %s438_s13 = scalar_select %p437_p5, %s1537_s29, 1 }
  0x9f   : > { %s436_s24 = scalar_lea.vmem [#allocation14], %s1116_s9  ;;  %s2028_s22 = sld [smem:[#allocation27_spill]] }
  0xa0   : > { %s1140_s6 = sshll.u32 %s438_s13, 4  ;;  %s940_s10 = sshll.u32 %s436_s24, 4  ;;  %s1923_s10 = int_to_ptr.vmem [resolvable:$true] %s940_s10 }
  0xa1   : > { %s444_s28 = scalar_lea.vmem %s1977_s3, %s1140_s6  ;;  %s926_s29 = scalar_lea.sflag [#allocation8], %s1839_s25 }
  0xa2   : > { %v623_v43 = vld [vmem:[#allocation2] sm:$0x1]  ;;  %s1455_s23 = scalar_lea.vmem %s1923_s10, 256  ;;  %s1556_s17 = smov [#allocation14]  }
  0xa3   : > { %p1456_p10 = scmp.ne.s32.totalorder %s1923_s10, %s1455_s23  ;;  %p2029_p13 = scmp.ne.s32.totalorder %s2027_s21, 0 }
  0xa4   : > { %s1459_s9 = sshll.u32 %s1556_s17, 4  ;;  %s1460_s9 = int_to_ptr.vmem [resolvable:$false] %s1459_s9 }
  0xa5   : > { %s1921_s14 = scalar_lea.hbm %s2028_s22, %s1141_s18  ;;  %p1457_p7 = pnand %p1456_p10, %p2029_p13 }
  0xa6   : > { %p1462_p6 = scmp.lt.s32.totalorder %s1923_s10, %s1460_s9 }
  0xa7   : > { %p1458_p3 = pneg %p1457_p7 }
 0x11a   : > { %v473_v2 = vpop.trf.xlu0 }
 0x11b   : > { %1167 = vmatprep.mubr.msk.f32.mxu0 %vm489_vm1, %v473_v2 }
 0x11e   : > { %v474_v3 = vpop.trf.xlu0 }
 0x11f   : > { %1168 = vmatmul.mubr.msk.f32.vlgmr.msra.gmra.mrb[0].mxu0 %vm489_vm1, %v474_v3 }
 0x122   : > { %v475_v4 = vpop.trf.xlu0 }
 0x123   : > { %1170 = vmatprep.mubr.msk.f32.mxu0 %vm489_vm1, %v475_v4 }
 0x126   : > { %v476_v5 = vpop.trf.xlu0 }
 0x127   : > { %1171 = vmatmul.mubr.msk.f32.gmra.mrb[2].mxu0 %vm489_vm1, %v476_v5 }
 0x12a   : > { %v477_v6 = vpop.trf.xlu0 }
 0x12b   : > { %1173 = vmatprep.mubr.msk.f32.mxu0 %vm489_vm1, %v477_v6 }
 0x12e   : > { %v478_v7 = vpop.trf.xlu0 }
 0x12f   : > { %1174 = vmatmul.mubr.msk.f32.gmra.mrb[4].mxu0 %vm489_vm1, %v478_v7 }
 0x132   : > { %v479_v8 = vpop.trf.xlu0 }
 0x133   : > { %1176 = vmatprep.mubr.msk.f32.mxu0 %vm489_vm1, %v479_v8 }
 0x136   : > { %v480_v9 = vpop.trf.xlu0 }
 0x137   : > { %1177 = vmatmul.mubr.msk.f32.gmra.mrb[6].mxu0 %vm489_vm1, %v480_v9 }
 0x1f2   : > { %v1169_v13 = vpop.f32.mrb[0].mxu0 }
 0x1f3   : > { %v584_v14 = vpop.f32.mrb[1].mxu0  ;;  %v626_v18 = vsel %vm452_vm3, %v1169_v13, -inf }
 0x1f4   : > { %v625_v21 = vsel %vm452_vm3, %v584_v14, -inf }
 0x1fa   : > { %v1172_v15 = vpop.f32.mrb[2].mxu0 }
 0x1fb   : > { %v594_v16 = vpop.f32.mrb[3].mxu0  ;;  %v628_v27 = vsel %vm452_vm3, %v1172_v15, -inf }
 0x1fc   : > { %v627_v30 = vsel %vm452_vm3, %v594_v16, -inf }
 0x202   : > { %v1175_v17 = vpop.f32.mrb[4].mxu0 }
 0x203   : > { %v631_v19 = vsel %vm452_vm3, %v1175_v17, -inf  ;;  %v604_v20 = vpop.f32.mrb[5].mxu0 }
 0x204   : > { %v632_v22 = vmax.f32 %v626_v18, %v631_v19  ;;  %v629_v23 = vsel %vm452_vm3, %v604_v20, -inf }
 0x205   : > { %v630_v24 = vmax.f32 %v625_v21, %v629_v23 }
 0x207   : > { %v637_v25 = vmax.f32 %v630_v24, %v632_v22 }
 0x20a   : > { %v1178_v26 = vpop.f32.mrb[6].mxu0 }
 0x20b   : > { %v635_v28 = vsel %vm452_vm3, %v1178_v26, -inf  ;;  %v614_v29 = vpop.f32.mrb[7].mxu0 }
 0x20c   : > { %v636_v31 = vmax.f32 %v628_v27, %v635_v28  ;;  %v633_v32 = vsel %vm452_vm3, %v614_v29, -inf }
 0x20d   : > { %v634_v33 = vmax.f32 %v627_v30, %v633_v32  ;;  %v717_v30 = vld [vmem:[%s1855_s7 + $0x8] sm:$0xff]  ;;  %s1461_s7 = scalar_lea.vmem %s1460_s9, 512 }
 0x20e   : > { %p1463_p8 = scmp.lt.s32.totalorder %s1461_s7, %s1455_s23 }
 0x20f   : > { %v638_v34 = vmax.f32 %v634_v33, %v636_v31 }
 0x210   : > { %p1464_p12 = por %p1463_p8, %p1462_p6 }
 0x211   : > { %v639_v35 = vmax.f32 %v637_v25, %v638_v34 }
 0x212   : > { %p1465_p0 = pnand %p1464_p12, %p1458_p3 }
 0x213   : > { %v640_v36 = vrot.slane %v639_v35, 4 }
 0x215   : > { %v641_v37 = vmax.f32 %v639_v35, %v640_v36  ;;  %v680_v35 = vld [vmem:[#allocation3] sm:$0x1] }
 0x217   : > { %v642_v39 = vrot.slane %v641_v37, 2 }
 0x219   : > { %v643_v40 = vmax.f32 %v641_v37, %v642_v39 }
 0x21b   : > { %v644_v42 = vrot.slane %v643_v40, 1 }
 0x21d   : > { %v645_v44 = vmax.f32 %v643_v40, %v644_v42  ;;  %v819_v40 = vld [vmem:[#allocation12] sm:$0xff] }
 0x21e   : > { %1202 = vmatprep.mubr.msk.f32.mxu0 %vm833_vm4, %v819_v40  ;;  %v821_v42 = vld [vmem:[%s1979_s5] sm:$0xff] }
 0x21f   : > { %v646_v46 = vmax.f32 %v623_v43, %v645_v44 }
 0x221   : > { %v654_v47 = vrot.slane %v646_v46, %v1883_v45  ;;  %803 = vst.msk [vmem:[#allocation2] sm:$0x1] %vm449_vm2, %v646_v46  ;;  %v647_v18 = vsub.f32 %v623_v43, %v646_v46  ;;  %v1555_v43 = vmov 0  }
 0x222   : > { %1316 = vset.pattern.permute.xlu1 %v1555_v43  ;;  %1315 = vset.pattern.permute.xlu0 %v1555_v43 }
 0x223   : > { %v658_v48 = vsub.f32 %v594_v16, %v654_v47  ;;  %v659_v49 = vsub.f32 %v1172_v15, %v654_v47  ;;  %v660_v50 = vsub.f32 %v604_v20, %v654_v47  ;;  %v662_v51 = vsub.f32 %v614_v29, %v654_v47  ;;  %830 = vperm.xlu1 %1316, %v822_v41  }
 0x224   : > { %v656_v52 = vsub.f32 %v584_v14, %v654_v47  ;;  %v657_v53 = vsub.f32 %v1169_v13, %v654_v47  ;;  %v661_v54 = vsub.f32 %v1175_v17, %v654_v47  ;;  %v663_v55 = vsub.f32 %v1178_v26, %v654_v47  ;;  %825 = vperm.xlu0 %1315, %v821_v42   ;;  %v707_v47 = vld [vmem:[#allocation4 + $0x8] sm:$0xff] }
 0x225   : > { %v668_v56 = vmul.f32 1.442695, %v658_v48  ;;  %v670_v57 = vmul.f32 1.442695, %v659_v49  ;;  %v676_v58 = vmul.f32 1.442695, %v662_v51 }
 0x226   : > { %v664_v59 = vmul.f32 1.442695, %v656_v52  ;;  %v666_v60 = vmul.f32 1.442695, %v657_v53  ;;  %v672_v61 = vmul.f32 1.442695, %v660_v50 }
 0x227   : > { %1317 = vpow2.f32 %v668_v56  ;;  %v674_v62 = vmul.f32 1.442695, %v661_v54  ;;  %v678_v63 = vmul.f32 1.442695, %v663_v55  ;;  %v648_v23 = vmul.f32 1.442695, %v647_v18 }
 0x228   : > { %1319 = vpow2.f32 %v670_v57  ;;  %v706_v48 = vld [vmem:[#allocation4] sm:$0xff] }
 0x229   : > { %1321 = vpow2.f32 %v676_v58 }
 0x22a   : > { %1323 = vpow2.f32 %v664_v59 }
 0x22b   : > { %1325 = vpow2.f32 %v666_v60 }
 0x22c   : > { %1327 = vpow2.f32 %v672_v61 }
 0x22d   : > { %1329 = vpow2.f32 %v674_v62  ;;  %v820_v62 = vld [vmem:[#allocation12 + $0x8] sm:$0xff] }
 0x22e   : > { %1331 = vpow2.f32 %v678_v63 }
 0x22f   : > { %1333 = vpow2.f32 %v648_v23 }
 0x231   : > { %v1318_v0 = vpop.eup %1317 }
 0x232   : > { %v1320_v1 = vpop.eup %1319  ;;  %v685_v13 = vsel %vm452_vm3, %v1318_v0, 0.0 }
 0x233   : > { %v1322_v2 = vpop.eup %1321  ;;  %v1209_v3 = vpack.c.bf16 %v1320_v1, %v1318_v0  ;;  %v687_v17 = vsel %vm452_vm3, %v1320_v1, 0.0  ;;  %v916_v1 = vstv %s915_s12 }
 0x234   : > { %v1324_v4 = vpop.eup %1323  ;;  %v693_v25 = vsel %vm452_vm3, %v1322_v2, 0.0 }
 0x235   : > { %v1326_v5 = vpop.eup %1325  ;;  %v682_v6 = vsel %vm452_vm3, %v1324_v4, 0.0 }
 0x236   : > { %v1328_v7 = vpop.eup %1327  ;;  %v683_v8 = vsel %vm452_vm3, %v1326_v5, 0.0  ;;  %v1205_v9 = vpack.c.bf16 %v1326_v5, %v1324_v4  ;;  %v920_v4 = vld [vmem:[%s444_s28 + $0x8] sm:$0xff] }
 0x237   : > { %v1330_v10 = vpop.eup %1329  ;;  %v684_v11 = vadd.f32 %v683_v8, %v682_v6  ;;  %v689_v20 = vsel %vm452_vm3, %v1328_v7, 0.0 }
 0x238   : > { %v1332_v12 = vpop.eup %1331  ;;  %1206 = vmatprep.subr.bf16.mxu1 %v1205_v9  ;;  %v1213_v14 = vpack.c.bf16 %v1330_v10, %v1328_v7  ;;  %v691_v22 = vsel %vm452_vm3, %v1330_v10, 0.0  ;;  %v919_v7 = vld [vmem:[%s444_s28] sm:$0xff] }
 0x239   : > { %v686_v15 = vadd.f32 %v685_v13, %v684_v11  ;;  %1208 = vmatpush3.bf16.msra.mxu1 %v1205_v9  ;;  %v1217_v16 = vpack.c.bf16 %v1332_v12, %v1322_v2  ;;  %v695_v27 = vsel %vm452_vm3, %v1332_v12, 0.0  ;;  %v1334_v34 = vpop.eup %1333 }
 0x23a   : > { %1210 = vmatprep.subr.bf16.mxu1 %v1209_v3  ;;  %v681_v38 = vmul.f32 %v1334_v34, %v680_v35  ;;  %v712_v46 = vrot.slane %v1334_v34, %v1883_v45 }
 0x23b   : > { %v688_v19 = vadd.f32 %v687_v17, %v686_v15 }
 0x23c   : > { %v715_v49 = vmul.f32 %v712_v46, %v707_v47  ;;  %v714_v51 = vmul.f32 %v712_v46, %v706_v48 }
 0x23d   : > { %v690_v21 = vadd.f32 %v689_v20, %v688_v19  ;;  %1212 = vmatpush3.bf16.msra.mxu1 %v1209_v3 }
 0x23e   : > { %1214 = vmatprep.subr.bf16.mxu1 %v1213_v14 }
 0x23f   : > { %v692_v24 = vadd.f32 %v691_v22, %v690_v21 }
 0x241   : > { %v694_v26 = vadd.f32 %v693_v25, %v692_v24  ;;  %1216 = vmatpush3.bf16.msra.mxu1 %v1213_v14 }
 0x242   : > { %1218 = vmatprep.subr.bf16.mxu1 %v1217_v16 }
 0x243   : > { %v696_v28 = vadd.f32 %v695_v27, %v694_v26 }
 0x245   : > { %v697_v29 = vrot.slane %v696_v28, 4  ;;  %1220 = vmatpush3.bf16.msra.mxu1 %v1217_v16 }
 0x247   : > { %v698_v31 = vadd.f32 %v697_v29, %v696_v28 }
 0x248   : > { %1196 = vmatmul.mubr.msk.f32.vlgmr.msra.gmra.mrb[0].mxu1 %vm452_vm3, %v717_v30 }
 0x249   : > { %v699_v32 = vrot.slane %v698_v31, 2 }
 0x24b   : > { %v700_v33 = vadd.f32 %v699_v32, %v698_v31 }
 0x24d   : > { %v701_v36 = vrot.slane %v700_v33, 1 }
 0x24f   : > { %v702_v37 = vadd.f32 %v701_v36, %v700_v33 }
 0x251   : > { %v703_v39 = vadd.f32 %v702_v37, %v681_v38 }
 0x253   : > { %705 = vst.msk [vmem:[#allocation3] sm:$0x1] %vm449_vm2, %v703_v39 }
 0x25a   : > { %v807_v44 = vld [vmem:[#allocation3] sm:$0x1] }
 0x25b   : > { %1335 = vrcp.f32 %v807_v44 }
 0x265   : > { %v1336_v55 = vpop.eup %1335 }
 0x266   : > { %v815_v56 = vrot.slane %v1336_v55, %v1883_v45 }
 0x2a2   : > { %v831_v63 = vpop.permute.xlu1 %830 }
 0x2a3   : > { %v826_v45 = vpop.permute.xlu0 %825 }
 0x31b   : > { %v1197_v50 = vpop.f32.mrb[0].mxu1 }
 0x31c   : > { %v800_v52 = vadd.f32 %v1197_v50, %v715_v49  ;;  %v790_v53 = vpop.f32.mrb[1].mxu1 }
 0x31d   : > { %v799_v54 = vadd.f32 %v790_v53, %v714_v51 }
 0x31e   : > { %802 = vst.msk [vmem:[#allocation4 + $0x8] sm:$0xff] %vm452_vm3, %v800_v52 }
 0x31f   : > { %801 = vst.msk [vmem:[#allocation4] sm:$0xff] %vm452_vm3, %v799_v54 }
 0x325   : > { %v810_v57 = vld [vmem:[#allocation4 + $0x8] sm:$0xff] }
 0x326   : > { %v809_v58 = vld [vmem:[#allocation4] sm:$0xff]  ;;  %v818_v59 = vmul.f32 %v815_v56, %v810_v57 }
 0x327   : > { %v817_v60 = vmul.f32 %v815_v56, %v809_v58 }
 0x329   : > { %v1221_v61 = vpack.c.bf16 %v818_v59, %v817_v60 }
 0x32b   : > { %1222 = vmatprep.subr.bf16.mxu0 %v1221_v61 }
 0x32c   : > { %1224 = vmatpush3.bf16.msra.mxu0 %v1221_v61 }
 0x32f   : > { %1203 = vmatmul.mubr.msk.f32.vlgmr.msra.gmra.mrb[8].mxu0 %vm833_vm4, %v820_v62 }
 0x402   : > { %v1204_v0 = vpop.f32.mrb[8].mxu0 }
 0x403   : > { %v912_v2 = vadd.f32 %v1204_v0, %v831_v63  ;;  %v906_v3 = vpop.f32.mrb[9].mxu0 }
 0x404   : > { %v907_v5 = vadd.f32 %v906_v3, %v826_v45 }
 0x405   : > { %v918_v6 = vmul.f32 %v916_v1, %v912_v2 }
 0x406   : > { %v917_v8 = vmul.f32 %v916_v1, %v907_v5 }
 0x407   : > { %v922_v9 = vadd.f32 %v920_v4, %v918_v6 }
 0x408   : > { %v921_v10 = vadd.f32 %v919_v7, %v917_v8 }
 0x409   : > { %924 = vst.msk [vmem:[%s436_s24 + $0x8] sm:$0xff] %vm452_vm3, %v922_v9 }
 0x40a   : > { %923 = vst.msk [vmem:[%s436_s24] sm:$0xff] %vm452_vm3, %v921_v10 }
 0x40b   : > { %1468 = shalt.err (!%p1465_p0)
}
 0x40c   : > { %s1469_s20 = scalar_lea.hbm %s1921_s14, 256  ;;  %s1473_s16 = scalar_lea.hbm %s2028_s22, 512 }
 0x40d   : > { %p1470_p2 = scmp.ne.s32.totalorder %s1921_s14, %s1469_s20  ;;  %p1474_p4 = scmp.lt.u32.totalorder %s1921_s14, %s2028_s22 }
 0x40e   : > { %p1475_p11 = scmp.lt.u32.totalorder %s1473_s16, %s1469_s20  ;;  %p1477_p10 = scmp.lt.u32.totalorder %s1469_s20, %s1921_s14 }
 0x40f   : > { %p1471_p9 = pnand %p1470_p2, %p2029_p13 }
 0x410   : > { %p1476_p5 = por %p1475_p11, %p1474_p4 }
 0x411   : > { %p1472_p1 = pneg %p1471_p9 }
 0x412   : > { %p1478_p7 = por %p1477_p10, %p1476_p5 }
 0x414   : > { %p1479_p3 = pnand %p1478_p7, %p1472_p1 }
 0x416   : > { %1482 = shalt.err (!%p1479_p3)
}
 0x417   : > { %s1557_s6 = smov 128   ;;  %s1558_s11 = smov 8  }
 0x418   : > { %1235 = dma.vmem_to_hbm [thread:$0]  (%p2029_p13), %s1923_s10, 256, %s1921_s14, %s926_s29, %s1557_s6, %s1557_s6, %s1558_s11  }
 0x419 PF: > { %s2030_s1 = sld [smem:[#allocation19_spill]]  ;;  %s2031_s28 = sld [smem:[#allocation25_spill]] }
 0x41a   : > { %s2032_s18 = sld [smem:[#allocation21_spill]] }
 0x41f   : > { %s955_s24 = sand.u32 1, %s2030_s1   ;;  %p2033_p6 = scmp.ne.s32.totalorder %s2031_s28, 0 }
 0x420   : > { %p2034_p8 = scmp.ge.s32.totalorder %s2032_s18, 2  ;;  %s956_s8 = scalar_lea.sflag [#allocation8], %s955_s24 }
 0x422   : > { %p1252_p12 = pnand %p2034_p8, %p2033_p6 }
 0x424   : > { %1520 = dma.done.wait (!%p1252_p12), %s956_s8, 256  }
 0x425   : > { %1522 = vsyncadd (!%p1252_p12), %s956_s8, 4294967040  ;;  %s28_s8 = sadd.s32 1, %s2032_s18   ;;  %s2035_s15 = sld [smem:[#allocation20_spill]] }
 0x426   : > { %p25_p0 = scmp.ge.s32.totalorder %s28_s8, 4   ;;  %s2036_s28 = sld [smem:[#allocation23_spill]] }
 0x427   : > { %s2037_s25 = sld [smem:[#allocation22_spill]]  ;;  %s2038_s26 = smov %s1529_s27 }
 0x428   : > { %s2040_s29 = smov %s1541_s30  ;;  %27 = sbr.rel (!%p25_p0) target bundleno = 13 (0xd), region = 132 }
 0x42b   : > { %s2039_s27 = smov %s2035_s15 }
 0x42d   : > { %s2041_s30 = smov %s2037_s25 }
 0x42f   :  { %961 = vsyncpa [#allocation7], 1 }
 0x430   :  { %963 = vsyncpa [#allocation7 + $0x1], 1 }
 0x431   :  { %964 = vsyncpa [#allocation10], 1 }
 0x432   :  { %966 = vsyncpa [#allocation10 + $0x1], 1 }
 0x433   :  { %967 = vsyncpa [#allocation13], 1 }
 0x434   :  { %968 = vsyncpa [#allocation8], 1 }
 0x435   :  { %970 = vsyncpa [#allocation8 + $0x1], 1 }

</bundles_post_ra>
